<compile_context>
chip_gen: v7x
topology: tpu7x:2x2x1
jax: 0.10.0
libtpu: 0.0.40
codegen_flags: <defaults>
</compile_context>

<pallas_src>
import jax
import jax.numpy as jnp
from jax import lax
from jax.experimental import pallas as pl
from jax.experimental.pallas import tpu as pltpu

# ------------------------- tiny Llama config -------------------------
VOCAB = 128
HIDDEN = 32
N_LAYERS = 2
N_HEADS = 4
HEAD_DIM = HIDDEN // N_HEADS          # 8
HALF = HEAD_DIM // 2                  # 4
INTER = 64
QKV_PAD = 128                         # 3*HIDDEN = 96 zero-padded to a full 128-lane row
SEQ = 8
EPS = 1e-6
ROPE_THETA = 10000.0
MASK_VAL = -3.0e4                     # finite: exp underflows cleanly to 0 in f32


# ------------------------- fused kernel ------------------------------
def _rms(x, w):
    # x: (T, H) f32, w: (1, H) f32
    var = jnp.mean(x * x, axis=-1, keepdims=True)
    return x * lax.rsqrt(var + EPS) * w


def _fused_kernel(ids_ref, embed_ref, cos_ref, sin_ref, mask_ref, rot_ref,
                  fnorm_ref, ln_ref, wqkv_ref, wo_ref, wgu_ref, wd_ref,
                  hid_ref):
    # ---- embedding gather as a one-hot MXU matmul (VOCAB fills the 128-lane dim) ----
    ids = ids_ref[...]                                               # (T, 1) int32
    iota = lax.broadcasted_iota(jnp.int32, (SEQ, VOCAB), 1)
    onehot = (iota == ids).astype(jnp.bfloat16)                      # (T, VOCAB)
    h = jnp.dot(onehot, embed_ref[...],
                preferred_element_type=jnp.float32)                  # (T, H) f32 residual

    cos = cos_ref[...]                                               # (T, H) f32
    sin = sin_ref[...]
    mask = mask_ref[...]                                             # (T, T) additive mask
    rot = rot_ref[...]                                               # (H, H) bf16 signed perm

    for l in range(N_LAYERS):          # statically unrolled; all weights VMEM-resident
        ln = ln_ref[l]                 # (2, H) f32: [input_norm, post_attn_norm]

        # ---------------- attention block ----------------
        x = _rms(h, ln[0:1, :]).astype(jnp.bfloat16)
        qkv = jnp.dot(x, wqkv_ref[l],
                      preferred_element_type=jnp.float32)            # (T, 128) f32
        q = qkv[:, 0:HIDDEN]
        k = qkv[:, HIDDEN:2 * HIDDEN]
        v = qkv[:, 2 * HIDDEN:3 * HIDDEN].astype(jnp.bfloat16)

        # full-width RoPE: rotate-half as a signed-permutation matmul (MXU),
        # 1/sqrt(head_dim) already folded into the Q columns of Wqkv.
        q = (q * cos + jnp.dot(q.astype(jnp.bfloat16), rot,
                               preferred_element_type=jnp.float32) * sin
             ).astype(jnp.bfloat16)
        k = (k * cos + jnp.dot(k.astype(jnp.bfloat16), rot,
                               preferred_element_type=jnp.float32) * sin
             ).astype(jnp.bfloat16)

        # per-head attention; head concat folded into per-head Wo accumulation
        attn = jnp.zeros((SEQ, HIDDEN), jnp.float32)
        for hd in range(N_HEADS):
            b = hd * HEAD_DIM
            qh = q[:, b:b + HEAD_DIM]
            kh = k[:, b:b + HEAD_DIM]
            vh = v[:, b:b + HEAD_DIM]
            s = jnp.dot(qh, kh.T, preferred_element_type=jnp.float32) + mask
            p = jnp.exp(s)                                           # finite mask, no max-sub
            p = p / jnp.sum(p, axis=-1, keepdims=True)               # exact division
            o_h = jnp.dot(p.astype(jnp.bfloat16), vh,
                          preferred_element_type=jnp.float32).astype(jnp.bfloat16)
            attn = attn + jnp.dot(o_h, wo_ref[l, hd],                # (8,8)@(8,32)
                                  preferred_element_type=jnp.float32)
        h = h + attn

        # ---------------- SwiGLU MLP with fused [Wg|Wu] (128 lanes) ----------------
        x = _rms(h, ln[1:2, :]).astype(jnp.bfloat16)
        gu = jnp.dot(x, wgu_ref[l], preferred_element_type=jnp.float32)   # (T, 2*INTER)
        g = gu[:, :INTER]
        u = gu[:, INTER:]
        act = (g * (1.0 / (1.0 + jnp.exp(-g))) * u).astype(jnp.bfloat16)
        h = h + jnp.dot(act, wd_ref[l], preferred_element_type=jnp.float32)

    # ---------------- final RMSNorm ----------------
    hid_ref[...] = _rms(h, fnorm_ref[...])


def _build_forward():
    n_inputs = 12
    vmem = lambda: pl.BlockSpec(memory_space=pltpu.MemorySpace.VMEM)
    return pl.pallas_call(
        _fused_kernel,
        out_shape=jax.ShapeDtypeStruct((SEQ, HIDDEN), jnp.float32),
        in_specs=[vmem() for _ in range(n_inputs)],
        out_specs=vmem(),
    )


_fused_forward = _build_forward()


# ------------------------- glue: params / rope / forward -------------
def init_params(key):
    def dense(k, shape):
        return jax.random.normal(k, shape, jnp.float32) * 0.02

    keys = jax.random.split(key, 1 + N_LAYERS)
    scale = 1.0 / (HEAD_DIM ** 0.5)
    wqkv, wo, wgu, wd, ln = [], [], [], [], []
    for i in range(N_LAYERS):
        lk = jax.random.split(keys[1 + i], 5)
        w_qkv = dense(lk[0], (HIDDEN, 3 * HIDDEN))
        # fold attention scale 1/sqrt(head_dim) into the Q projection columns
        w_qkv = w_qkv.at[:, :HIDDEN].multiply(scale)
        # zero-pad 96 -> 128 output lanes so the qkv intermediate is lane-dense
        w_qkv = jnp.pad(w_qkv, ((0, 0), (0, QKV_PAD - 3 * HIDDEN)))
        wqkv.append(w_qkv)
        # Wo stored per head: (n_heads, head_dim, hidden) for leading-dim indexing
        wo.append(dense(lk[1], (HIDDEN, HIDDEN)).reshape(N_HEADS, HEAD_DIM, HIDDEN))
        wgu.append(jnp.concatenate([dense(lk[2], (HIDDEN, INTER)),
                                    dense(lk[3], (HIDDEN, INTER))], axis=-1))
        wd.append(dense(lk[4], (INTER, HIDDEN)))
        ln.append(jnp.ones((2, HIDDEN), jnp.float32))
    return {
        "embed": dense(keys[0], (VOCAB, HIDDEN)).astype(jnp.bfloat16),
        "final_norm": jnp.ones((1, HIDDEN), jnp.float32),
        "ln": jnp.stack(ln),                               # (L, 2, H) f32
        "wqkv": jnp.stack(wqkv).astype(jnp.bfloat16),      # (L, H, 128)
        "wo": jnp.stack(wo).astype(jnp.bfloat16),          # (L, nH, dh, H)
        "wgu": jnp.stack(wgu).astype(jnp.bfloat16),        # (L, H, 2*INTER)
        "wd": jnp.stack(wd).astype(jnp.bfloat16),          # (L, INTER, H)
    }


def rope_tables(positions):
    inv_freq = 1.0 / (ROPE_THETA ** (
        jnp.arange(0, HEAD_DIM, 2, dtype=jnp.float32) / HEAD_DIM))
    freqs = positions.astype(jnp.float32)[:, None] * inv_freq[None, :]   # (T, dh/2)
    cos = jnp.concatenate([jnp.cos(freqs), jnp.cos(freqs)], axis=-1)     # (T, dh)
    sin = jnp.concatenate([jnp.sin(freqs), jnp.sin(freqs)], axis=-1)
    # tile across heads -> (T, HIDDEN) so RoPE applies to the full Q/K slab at once
    return jnp.tile(cos, (1, N_HEADS)), jnp.tile(sin, (1, N_HEADS))


def rotate_half_matrix():
    # rot = x @ R implements neox rotate-half independently within each head's lanes
    r = jnp.zeros((HIDDEN, HIDDEN), jnp.float32)
    for hd in range(N_HEADS):
        b = hd * HEAD_DIM
        for j in range(HALF):
            r = r.at[b + j + HALF, b + j].set(-1.0)   # rot[:, b+j]      = -x[:, b+j+HALF]
            r = r.at[b + j, b + j + HALF].set(1.0)    # rot[:, b+j+HALF] =  x[:, b+j]
    return r.astype(jnp.bfloat16)


_ROT = rotate_half_matrix()


def causal_mask():
    qi = jnp.arange(SEQ, dtype=jnp.int32)[:, None]
    kj = jnp.arange(SEQ, dtype=jnp.int32)[None, :]
    return jnp.where(kj <= qi, 0.0, MASK_VAL).astype(jnp.float32)


# TODO(synk): vLLM kv_caches / AttentionMetadata (paged KV cache, decode path)
# have no clean equivalent here; this implements the prefill causal-attention path.
@jax.jit
def llama_embedding_forward(params, input_ids, positions):
    cos, sin = rope_tables(positions)
    mask = causal_mask()
    hidden = _fused_forward(
        input_ids.astype(jnp.int32).reshape(SEQ, 1),
        params["embed"], cos, sin, mask, _ROT, params["final_norm"],
        params["ln"], params["wqkv"], params["wo"], params["wgu"], params["wd"])
    # Pooler (LAST token, L2-normalized) is a negligible op; done outside the kernel.
    last = hidden[SEQ - 1:SEQ, :]
    nrm = jnp.sqrt(jnp.sum(last * last, axis=-1, keepdims=True))
    pooled = last / jnp.maximum(nrm, 1e-12)
    return hidden, pooled


if __name__ == "__main__":
    key = jax.random.PRNGKey(0)
    pkey, ikey = jax.random.split(key)
    params = init_params(pkey)

    input_ids = jax.random.randint(ikey, (SEQ,), 0, VOCAB, dtype=jnp.int32)
    positions = jnp.arange(SEQ, dtype=jnp.int32)

    hidden, pooled = llama_embedding_forward(params, input_ids, positions)
    hidden, pooled = jax.block_until_ready((hidden, pooled))

    assert hidden.shape == (SEQ, HIDDEN) and pooled.shape == (1, HIDDEN)
    assert bool(jnp.all(jnp.isfinite(hidden))) and bool(jnp.all(jnp.isfinite(pooled)))
    assert abs(float(jnp.linalg.norm(pooled)) - 1.0) < 1e-3
    print("KERNEL_OK")
</pallas_src>

<mosaic_0001>
module attributes {stable_mosaic.version = 11 : i64} {
  func.func @_fused_kernel(%arg0: memref<8x1xi32, #tpu.memory_space<vmem>>, %arg1: memref<128x32xbf16, #tpu.memory_space<vmem>>, %arg2: memref<8x32xf32, #tpu.memory_space<vmem>>, %arg3: memref<8x32xf32, #tpu.memory_space<vmem>>, %arg4: memref<8x8xf32, #tpu.memory_space<vmem>>, %arg5: memref<32x32xbf16, #tpu.memory_space<vmem>>, %arg6: memref<1x32xf32, #tpu.memory_space<vmem>>, %arg7: memref<2x2x32xf32, #tpu.memory_space<vmem>>, %arg8: memref<2x32x128xbf16, #tpu.memory_space<vmem>>, %arg9: memref<2x4x8x32xbf16, #tpu.memory_space<vmem>>, %arg10: memref<2x32x128xbf16, #tpu.memory_space<vmem>>, %arg11: memref<2x64x32xbf16, #tpu.memory_space<vmem>>, %arg12: memref<8x32xf32, #tpu.memory_space<vmem>>) attributes {dimension_semantics = [], scalar_prefetch = 0 : i64, scratch_operands = 0 : i64, tpu.core_type = #tpu.core_type<tc>} {
    %c0 = arith.constant 0 : index
    %c0_0 = arith.constant 0 : index
    %0 = vector.load %arg0[%c0, %c0_0] : memref<8x1xi32, #tpu.memory_space<vmem>>, vector<8x1xi32>
    %1 = tpu.iota {dimensions = array<i32: 1>} : vector<8x128xi32>
    %2 = vector.broadcast %0 : vector<8x1xi32> to vector<8x128xi32>
    %3 = arith.cmpi eq, %1, %2 : vector<8x128xi32>
    %4 = arith.extui %3 : vector<8x128xi1> to vector<8x128xi32>
    %5 = arith.sitofp %4 : vector<8x128xi32> to vector<8x128xf32>
    %6 = arith.truncf %5 : vector<8x128xf32> to vector<8x128xbf16>
    %c0_1 = arith.constant 0 : index
    %c0_2 = arith.constant 0 : index
    %7 = vector.load %arg1[%c0_1, %c0_2] : memref<128x32xbf16, #tpu.memory_space<vmem>>, vector<128x32xbf16>
    %cst = arith.constant dense<0.000000e+00> : vector<8x32xf32>
    %8 = tpu.matmul %6, %7, %cst {dimension_numbers = #tpu.dot_dimension_numbers<[1], [0], [0], [1], [0, 0, 1, 1], [], []>} : vector<8x128xbf16>, vector<128x32xbf16>, vector<8x32xf32> -> vector<8x32xf32>
    %c0_3 = arith.constant 0 : index
    %c0_4 = arith.constant 0 : index
    %9 = vector.load %arg2[%c0_3, %c0_4] : memref<8x32xf32, #tpu.memory_space<vmem>>, vector<8x32xf32>
    %c0_5 = arith.constant 0 : index
    %c0_6 = arith.constant 0 : index
    %10 = vector.load %arg3[%c0_5, %c0_6] : memref<8x32xf32, #tpu.memory_space<vmem>>, vector<8x32xf32>
    %c0_7 = arith.constant 0 : index
    %c0_8 = arith.constant 0 : index
    %11 = vector.load %arg4[%c0_7, %c0_8] : memref<8x8xf32, #tpu.memory_space<vmem>>, vector<8x8xf32>
    %c0_9 = arith.constant 0 : index
    %c0_10 = arith.constant 0 : index
    %12 = vector.load %arg5[%c0_9, %c0_10] : memref<32x32xbf16, #tpu.memory_space<vmem>>, vector<32x32xbf16>
    %c0_11 = arith.constant 0 : index
    %c0_12 = arith.constant 0 : index
    %c0_13 = arith.constant 0 : index
    %13 = vector.load %arg7[%c0_11, %c0_12, %c0_13] : memref<2x2x32xf32, #tpu.memory_space<vmem>>, vector<1x2x32xf32>
    %14 = vector.shape_cast %13 : vector<1x2x32xf32> to vector<2x32xf32>
    %15 = vector.extract_strided_slice %14 {offsets = [0, 0], sizes = [1, 32], strides = [1, 1]} : vector<2x32xf32> to vector<1x32xf32>
    %16 = arith.mulf %8, %8 : vector<8x32xf32>
    %cst_14 = arith.constant dense<0.000000e+00> : vector<8xf32>
    %17 = vector.multi_reduction <add>, %16, %cst_14 [1] : vector<8x32xf32> to vector<8xf32>
    %18 = vector.shape_cast %17 : vector<8xf32> to vector<8x1xf32>
    %cst_15 = arith.constant 3.200000e+01 : f32
    %19 = vector.broadcast %cst_15 : f32 to vector<8x1xf32>
    %20 = arith.divf %18, %19 : vector<8x1xf32>
    %cst_16 = arith.constant 9.99999997E-7 : f32
    %21 = vector.broadcast %cst_16 : f32 to vector<8x1xf32>
    %22 = arith.addf %20, %21 : vector<8x1xf32>
    %23 = math.rsqrt %22 : vector<8x1xf32>
    %24 = vector.broadcast %23 : vector<8x1xf32> to vector<8x32xf32>
    %25 = arith.mulf %8, %24 : vector<8x32xf32>
    %26 = vector.broadcast %15 : vector<1x32xf32> to vector<8x32xf32>
    %27 = arith.mulf %25, %26 : vector<8x32xf32>
    %28 = arith.truncf %27 : vector<8x32xf32> to vector<8x32xbf16>
    %c0_17 = arith.constant 0 : index
    %c0_18 = arith.constant 0 : index
    %c0_19 = arith.constant 0 : index
    %29 = vector.load %arg8[%c0_17, %c0_18, %c0_19] : memref<2x32x128xbf16, #tpu.memory_space<vmem>>, vector<1x32x128xbf16>
    %30 = vector.shape_cast %29 : vector<1x32x128xbf16> to vector<32x128xbf16>
    %cst_20 = arith.constant dense<0.000000e+00> : vector<8x128xf32>
    %31 = tpu.matmul %28, %30, %cst_20 {dimension_numbers = #tpu.dot_dimension_numbers<[1], [0], [0], [1], [0, 0, 1, 1], [], []>} : vector<8x32xbf16>, vector<32x128xbf16>, vector<8x128xf32> -> vector<8x128xf32>
    %32 = vector.extract_strided_slice %31 {offsets = [0, 0], sizes = [8, 32], strides = [1, 1]} : vector<8x128xf32> to vector<8x32xf32>
    %33 = vector.extract_strided_slice %31 {offsets = [0, 32], sizes = [8, 32], strides = [1, 1]} : vector<8x128xf32> to vector<8x32xf32>
    %34 = vector.extract_strided_slice %31 {offsets = [0, 64], sizes = [8, 32], strides = [1, 1]} : vector<8x128xf32> to vector<8x32xf32>
    %35 = arith.truncf %34 : vector<8x32xf32> to vector<8x32xbf16>
    %36 = arith.mulf %32, %9 : vector<8x32xf32>
    %37 = arith.truncf %32 : vector<8x32xf32> to vector<8x32xbf16>
    %cst_21 = arith.constant dense<0.000000e+00> : vector<8x32xf32>
    %38 = tpu.matmul %37, %12, %cst_21 {dimension_numbers = #tpu.dot_dimension_numbers<[1], [0], [0], [1], [0, 0, 1, 1], [], []>} : vector<8x32xbf16>, vector<32x32xbf16>, vector<8x32xf32> -> vector<8x32xf32>
    %39 = arith.mulf %38, %10 : vector<8x32xf32>
    %40 = arith.addf %36, %39 : vector<8x32xf32>
    %41 = arith.truncf %40 : vector<8x32xf32> to vector<8x32xbf16>
    %42 = arith.mulf %33, %9 : vector<8x32xf32>
    %43 = arith.truncf %33 : vector<8x32xf32> to vector<8x32xbf16>
    %cst_22 = arith.constant dense<0.000000e+00> : vector<8x32xf32>
    %44 = tpu.matmul %43, %12, %cst_22 {dimension_numbers = #tpu.dot_dimension_numbers<[1], [0], [0], [1], [0, 0, 1, 1], [], []>} : vector<8x32xbf16>, vector<32x32xbf16>, vector<8x32xf32> -> vector<8x32xf32>
    %45 = arith.mulf %44, %10 : vector<8x32xf32>
    %46 = arith.addf %42, %45 : vector<8x32xf32>
    %47 = arith.truncf %46 : vector<8x32xf32> to vector<8x32xbf16>
    %cst_23 = arith.constant 0.000000e+00 : f32
    %48 = vector.broadcast %cst_23 : f32 to vector<8x32xf32>
    %49 = vector.extract_strided_slice %41 {offsets = [0, 0], sizes = [8, 8], strides = [1, 1]} : vector<8x32xbf16> to vector<8x8xbf16>
    %50 = vector.extract_strided_slice %47 {offsets = [0, 0], sizes = [8, 8], strides = [1, 1]} : vector<8x32xbf16> to vector<8x8xbf16>
    %51 = vector.extract_strided_slice %35 {offsets = [0, 0], sizes = [8, 8], strides = [1, 1]} : vector<8x32xbf16> to vector<8x8xbf16>
    %52 = tpu.transpose %50, [1, 0] : vector<8x8xbf16> -> vector<8x8xbf16>
    %cst_24 = arith.constant dense<0.000000e+00> : vector<8x8xf32>
    %53 = tpu.matmul %49, %52, %cst_24 {dimension_numbers = #tpu.dot_dimension_numbers<[1], [0], [0], [1], [0, 0, 1, 1], [], []>} : vector<8x8xbf16>, vector<8x8xbf16>, vector<8x8xf32> -> vector<8x8xf32>
    %54 = arith.addf %53, %11 : vector<8x8xf32>
    %55 = math.exp %54 : vector<8x8xf32>
    %cst_25 = arith.constant dense<0.000000e+00> : vector<8xf32>
    %56 = vector.multi_reduction <add>, %55, %cst_25 [1] : vector<8x8xf32> to vector<8xf32>
    %57 = vector.shape_cast %56 : vector<8xf32> to vector<8x1xf32>
    %58 = vector.broadcast %57 : vector<8x1xf32> to vector<8x8xf32>
    %59 = arith.divf %55, %58 : vector<8x8xf32>
    %60 = arith.truncf %59 : vector<8x8xf32> to vector<8x8xbf16>
    %cst_26 = arith.constant dense<0.000000e+00> : vector<8x8xf32>
    %61 = tpu.matmul %60, %51, %cst_26 {dimension_numbers = #tpu.dot_dimension_numbers<[1], [0], [0], [1], [0, 0, 1, 1], [], []>} : vector<8x8xbf16>, vector<8x8xbf16>, vector<8x8xf32> -> vector<8x8xf32>
    %62 = arith.truncf %61 : vector<8x8xf32> to vector<8x8xbf16>
    %c0_27 = arith.constant 0 : index
    %c0_28 = arith.constant 0 : index
    %c0_29 = arith.constant 0 : index
    %c0_30 = arith.constant 0 : index
    %63 = vector.load %arg9[%c0_27, %c0_28, %c0_29, %c0_30] : memref<2x4x8x32xbf16, #tpu.memory_space<vmem>>, vector<1x1x8x32xbf16>
    %64 = vector.shape_cast %63 : vector<1x1x8x32xbf16> to vector<8x32xbf16>
    %cst_31 = arith.constant dense<0.000000e+00> : vector<8x32xf32>
    %65 = tpu.matmul %62, %64, %cst_31 {dimension_numbers = #tpu.dot_dimension_numbers<[1], [0], [0], [1], [0, 0, 1, 1], [], []>} : vector<8x8xbf16>, vector<8x32xbf16>, vector<8x32xf32> -> vector<8x32xf32>
    %66 = arith.addf %48, %65 : vector<8x32xf32>
    %67 = vector.extract_strided_slice %41 {offsets = [0, 8], sizes = [8, 8], strides = [1, 1]} : vector<8x32xbf16> to vector<8x8xbf16>
    %68 = vector.extract_strided_slice %47 {offsets = [0, 8], sizes = [8, 8], strides = [1, 1]} : vector<8x32xbf16> to vector<8x8xbf16>
    %69 = vector.extract_strided_slice %35 {offsets = [0, 8], sizes = [8, 8], strides = [1, 1]} : vector<8x32xbf16> to vector<8x8xbf16>
    %70 = tpu.transpose %68, [1, 0] : vector<8x8xbf16> -> vector<8x8xbf16>
    %cst_32 = arith.constant dense<0.000000e+00> : vector<8x8xf32>
    %71 = tpu.matmul %67, %70, %cst_32 {dimension_numbers = #tpu.dot_dimension_numbers<[1], [0], [0], [1], [0, 0, 1, 1], [], []>} : vector<8x8xbf16>, vector<8x8xbf16>, vector<8x8xf32> -> vector<8x8xf32>
    %72 = arith.addf %71, %11 : vector<8x8xf32>
    %73 = math.exp %72 : vector<8x8xf32>
    %cst_33 = arith.constant dense<0.000000e+00> : vector<8xf32>
    %74 = vector.multi_reduction <add>, %73, %cst_33 [1] : vector<8x8xf32> to vector<8xf32>
    %75 = vector.shape_cast %74 : vector<8xf32> to vector<8x1xf32>
    %76 = vector.broadcast %75 : vector<8x1xf32> to vector<8x8xf32>
    %77 = arith.divf %73, %76 : vector<8x8xf32>
    %78 = arith.truncf %77 : vector<8x8xf32> to vector<8x8xbf16>
    %cst_34 = arith.constant dense<0.000000e+00> : vector<8x8xf32>
    %79 = tpu.matmul %78, %69, %cst_34 {dimension_numbers = #tpu.dot_dimension_numbers<[1], [0], [0], [1], [0, 0, 1, 1], [], []>} : vector<8x8xbf16>, vector<8x8xbf16>, vector<8x8xf32> -> vector<8x8xf32>
    %80 = arith.truncf %79 : vector<8x8xf32> to vector<8x8xbf16>
    %c0_35 = arith.constant 0 : index
    %c1 = arith.constant 1 : index
    %c0_36 = arith.constant 0 : index
    %c0_37 = arith.constant 0 : index
    %81 = vector.load %arg9[%c0_35, %c1, %c0_36, %c0_37] : memref<2x4x8x32xbf16, #tpu.memory_space<vmem>>, vector<1x1x8x32xbf16>
    %82 = vector.shape_cast %81 : vector<1x1x8x32xbf16> to vector<8x32xbf16>
    %cst_38 = arith.constant dense<0.000000e+00> : vector<8x32xf32>
    %83 = tpu.matmul %80, %82, %cst_38 {dimension_numbers = #tpu.dot_dimension_numbers<[1], [0], [0], [1], [0, 0, 1, 1], [], []>} : vector<8x8xbf16>, vector<8x32xbf16>, vector<8x32xf32> -> vector<8x32xf32>
    %84 = arith.addf %66, %83 : vector<8x32xf32>
    %85 = vector.extract_strided_slice %41 {offsets = [0, 16], sizes = [8, 8], strides = [1, 1]} : vector<8x32xbf16> to vector<8x8xbf16>
    %86 = vector.extract_strided_slice %47 {offsets = [0, 16], sizes = [8, 8], strides = [1, 1]} : vector<8x32xbf16> to vector<8x8xbf16>
    %87 = vector.extract_strided_slice %35 {offsets = [0, 16], sizes = [8, 8], strides = [1, 1]} : vector<8x32xbf16> to vector<8x8xbf16>
    %88 = tpu.transpose %86, [1, 0] : vector<8x8xbf16> -> vector<8x8xbf16>
    %cst_39 = arith.constant dense<0.000000e+00> : vector<8x8xf32>
    %89 = tpu.matmul %85, %88, %cst_39 {dimension_numbers = #tpu.dot_dimension_numbers<[1], [0], [0], [1], [0, 0, 1, 1], [], []>} : vector<8x8xbf16>, vector<8x8xbf16>, vector<8x8xf32> -> vector<8x8xf32>
    %90 = arith.addf %89, %11 : vector<8x8xf32>
    %91 = math.exp %90 : vector<8x8xf32>
    %cst_40 = arith.constant dense<0.000000e+00> : vector<8xf32>
    %92 = vector.multi_reduction <add>, %91, %cst_40 [1] : vector<8x8xf32> to vector<8xf32>
    %93 = vector.shape_cast %92 : vector<8xf32> to vector<8x1xf32>
    %94 = vector.broadcast %93 : vector<8x1xf32> to vector<8x8xf32>
    %95 = arith.divf %91, %94 : vector<8x8xf32>
    %96 = arith.truncf %95 : vector<8x8xf32> to vector<8x8xbf16>
    %cst_41 = arith.constant dense<0.000000e+00> : vector<8x8xf32>
    %97 = tpu.matmul %96, %87, %cst_41 {dimension_numbers = #tpu.dot_dimension_numbers<[1], [0], [0], [1], [0, 0, 1, 1], [], []>} : vector<8x8xbf16>, vector<8x8xbf16>, vector<8x8xf32> -> vector<8x8xf32>
    %98 = arith.truncf %97 : vector<8x8xf32> to vector<8x8xbf16>
    %c0_42 = arith.constant 0 : index
    %c2 = arith.constant 2 : index
    %c0_43 = arith.constant 0 : index
    %c0_44 = arith.constant 0 : index
    %99 = vector.load %arg9[%c0_42, %c2, %c0_43, %c0_44] : memref<2x4x8x32xbf16, #tpu.memory_space<vmem>>, vector<1x1x8x32xbf16>
    %100 = vector.shape_cast %99 : vector<1x1x8x32xbf16> to vector<8x32xbf16>
    %cst_45 = arith.constant dense<0.000000e+00> : vector<8x32xf32>
    %101 = tpu.matmul %98, %100, %cst_45 {dimension_numbers = #tpu.dot_dimension_numbers<[1], [0], [0], [1], [0, 0, 1, 1], [], []>} : vector<8x8xbf16>, vector<8x32xbf16>, vector<8x32xf32> -> vector<8x32xf32>
    %102 = arith.addf %84, %101 : vector<8x32xf32>
    %103 = vector.extract_strided_slice %41 {offsets = [0, 24], sizes = [8, 8], strides = [1, 1]} : vector<8x32xbf16> to vector<8x8xbf16>
    %104 = vector.extract_strided_slice %47 {offsets = [0, 24], sizes = [8, 8], strides = [1, 1]} : vector<8x32xbf16> to vector<8x8xbf16>
    %105 = vector.extract_strided_slice %35 {offsets = [0, 24], sizes = [8, 8], strides = [1, 1]} : vector<8x32xbf16> to vector<8x8xbf16>
    %106 = tpu.transpose %104, [1, 0] : vector<8x8xbf16> -> vector<8x8xbf16>
    %cst_46 = arith.constant dense<0.000000e+00> : vector<8x8xf32>
    %107 = tpu.matmul %103, %106, %cst_46 {dimension_numbers = #tpu.dot_dimension_numbers<[1], [0], [0], [1], [0, 0, 1, 1], [], []>} : vector<8x8xbf16>, vector<8x8xbf16>, vector<8x8xf32> -> vector<8x8xf32>
    %108 = arith.addf %107, %11 : vector<8x8xf32>
    %109 = math.exp %108 : vector<8x8xf32>
    %cst_47 = arith.constant dense<0.000000e+00> : vector<8xf32>
    %110 = vector.multi_reduction <add>, %109, %cst_47 [1] : vector<8x8xf32> to vector<8xf32>
    %111 = vector.shape_cast %110 : vector<8xf32> to vector<8x1xf32>
    %112 = vector.broadcast %111 : vector<8x1xf32> to vector<8x8xf32>
    %113 = arith.divf %109, %112 : vector<8x8xf32>
    %114 = arith.truncf %113 : vector<8x8xf32> to vector<8x8xbf16>
    %cst_48 = arith.constant dense<0.000000e+00> : vector<8x8xf32>
    %115 = tpu.matmul %114, %105, %cst_48 {dimension_numbers = #tpu.dot_dimension_numbers<[1], [0], [0], [1], [0, 0, 1, 1], [], []>} : vector<8x8xbf16>, vector<8x8xbf16>, vector<8x8xf32> -> vector<8x8xf32>
    %116 = arith.truncf %115 : vector<8x8xf32> to vector<8x8xbf16>
    %c0_49 = arith.constant 0 : index
    %c3 = arith.constant 3 : index
    %c0_50 = arith.constant 0 : index
    %c0_51 = arith.constant 0 : index
    %117 = vector.load %arg9[%c0_49, %c3, %c0_50, %c0_51] : memref<2x4x8x32xbf16, #tpu.memory_space<vmem>>, vector<1x1x8x32xbf16>
    %118 = vector.shape_cast %117 : vector<1x1x8x32xbf16> to vector<8x32xbf16>
    %cst_52 = arith.constant dense<0.000000e+00> : vector<8x32xf32>
    %119 = tpu.matmul %116, %118, %cst_52 {dimension_numbers = #tpu.dot_dimension_numbers<[1], [0], [0], [1], [0, 0, 1, 1], [], []>} : vector<8x8xbf16>, vector<8x32xbf16>, vector<8x32xf32> -> vector<8x32xf32>
    %120 = arith.addf %102, %119 : vector<8x32xf32>
    %121 = arith.addf %8, %120 : vector<8x32xf32>
    %122 = vector.extract_strided_slice %14 {offsets = [1, 0], sizes = [1, 32], strides = [1, 1]} : vector<2x32xf32> to vector<1x32xf32>
    %123 = arith.mulf %121, %121 : vector<8x32xf32>
    %cst_53 = arith.constant dense<0.000000e+00> : vector<8xf32>
    %124 = vector.multi_reduction <add>, %123, %cst_53 [1] : vector<8x32xf32> to vector<8xf32>
    %125 = vector.shape_cast %124 : vector<8xf32> to vector<8x1xf32>
    %cst_54 = arith.constant 3.200000e+01 : f32
    %126 = vector.broadcast %cst_54 : f32 to vector<8x1xf32>
    %127 = arith.divf %125, %126 : vector<8x1xf32>
    %cst_55 = arith.constant 9.99999997E-7 : f32
    %128 = vector.broadcast %cst_55 : f32 to vector<8x1xf32>
    %129 = arith.addf %127, %128 : vector<8x1xf32>
    %130 = math.rsqrt %129 : vector<8x1xf32>
    %131 = vector.broadcast %130 : vector<8x1xf32> to vector<8x32xf32>
    %132 = arith.mulf %121, %131 : vector<8x32xf32>
    %133 = vector.broadcast %122 : vector<1x32xf32> to vector<8x32xf32>
    %134 = arith.mulf %132, %133 : vector<8x32xf32>
    %135 = arith.truncf %134 : vector<8x32xf32> to vector<8x32xbf16>
    %c0_56 = arith.constant 0 : index
    %c0_57 = arith.constant 0 : index
    %c0_58 = arith.constant 0 : index
    %136 = vector.load %arg10[%c0_56, %c0_57, %c0_58] : memref<2x32x128xbf16, #tpu.memory_space<vmem>>, vector<1x32x128xbf16>
    %137 = vector.shape_cast %136 : vector<1x32x128xbf16> to vector<32x128xbf16>
    %cst_59 = arith.constant dense<0.000000e+00> : vector<8x128xf32>
    %138 = tpu.matmul %135, %137, %cst_59 {dimension_numbers = #tpu.dot_dimension_numbers<[1], [0], [0], [1], [0, 0, 1, 1], [], []>} : vector<8x32xbf16>, vector<32x128xbf16>, vector<8x128xf32> -> vector<8x128xf32>
    %139 = vector.extract_strided_slice %138 {offsets = [0, 0], sizes = [8, 64], strides = [1, 1]} : vector<8x128xf32> to vector<8x64xf32>
    %140 = vector.extract_strided_slice %138 {offsets = [0, 64], sizes = [8, 64], strides = [1, 1]} : vector<8x128xf32> to vector<8x64xf32>
    %cst_60 = arith.constant 0.000000e+00 : f32
    %141 = vector.broadcast %cst_60 : f32 to vector<8x64xf32>
    %142 = arith.subf %141, %139 : vector<8x64xf32>
    %143 = math.exp %142 : vector<8x64xf32>
    %cst_61 = arith.constant 1.000000e+00 : f32
    %144 = vector.broadcast %cst_61 : f32 to vector<8x64xf32>
    %145 = arith.addf %144, %143 : vector<8x64xf32>
    %cst_62 = arith.constant 1.000000e+00 : f32
    %146 = vector.broadcast %cst_62 : f32 to vector<8x64xf32>
    %147 = arith.divf %146, %145 : vector<8x64xf32>
    %148 = arith.mulf %139, %147 : vector<8x64xf32>
    %149 = arith.mulf %148, %140 : vector<8x64xf32>
    %150 = arith.truncf %149 : vector<8x64xf32> to vector<8x64xbf16>
    %c0_63 = arith.constant 0 : index
    %c0_64 = arith.constant 0 : index
    %c0_65 = arith.constant 0 : index
    %151 = vector.load %arg11[%c0_63, %c0_64, %c0_65] : memref<2x64x32xbf16, #tpu.memory_space<vmem>>, vector<1x64x32xbf16>
    %152 = vector.shape_cast %151 : vector<1x64x32xbf16> to vector<64x32xbf16>
    %cst_66 = arith.constant dense<0.000000e+00> : vector<8x32xf32>
    %153 = tpu.matmul %150, %152, %cst_66 {dimension_numbers = #tpu.dot_dimension_numbers<[1], [0], [0], [1], [0, 0, 1, 1], [], []>} : vector<8x64xbf16>, vector<64x32xbf16>, vector<8x32xf32> -> vector<8x32xf32>
    %154 = arith.addf %121, %153 : vector<8x32xf32>
    %c1_67 = arith.constant 1 : index
    %c0_68 = arith.constant 0 : index
    %c0_69 = arith.constant 0 : index
    %155 = vector.load %arg7[%c1_67, %c0_68, %c0_69] : memref<2x2x32xf32, #tpu.memory_space<vmem>>, vector<1x2x32xf32>
    %156 = vector.shape_cast %155 : vector<1x2x32xf32> to vector<2x32xf32>
    %157 = vector.extract_strided_slice %156 {offsets = [0, 0], sizes = [1, 32], strides = [1, 1]} : vector<2x32xf32> to vector<1x32xf32>
    %158 = arith.mulf %154, %154 : vector<8x32xf32>
    %cst_70 = arith.constant dense<0.000000e+00> : vector<8xf32>
    %159 = vector.multi_reduction <add>, %158, %cst_70 [1] : vector<8x32xf32> to vector<8xf32>
    %160 = vector.shape_cast %159 : vector<8xf32> to vector<8x1xf32>
    %cst_71 = arith.constant 3.200000e+01 : f32
    %161 = vector.broadcast %cst_71 : f32 to vector<8x1xf32>
    %162 = arith.divf %160, %161 : vector<8x1xf32>
    %cst_72 = arith.constant 9.99999997E-7 : f32
    %163 = vector.broadcast %cst_72 : f32 to vector<8x1xf32>
    %164 = arith.addf %162, %163 : vector<8x1xf32>
    %165 = math.rsqrt %164 : vector<8x1xf32>
    %166 = vector.broadcast %165 : vector<8x1xf32> to vector<8x32xf32>
    %167 = arith.mulf %154, %166 : vector<8x32xf32>
    %168 = vector.broadcast %157 : vector<1x32xf32> to vector<8x32xf32>
    %169 = arith.mulf %167, %168 : vector<8x32xf32>
    %170 = arith.truncf %169 : vector<8x32xf32> to vector<8x32xbf16>
    %c1_73 = arith.constant 1 : index
    %c0_74 = arith.constant 0 : index
    %c0_75 = arith.constant 0 : index
    %171 = vector.load %arg8[%c1_73, %c0_74, %c0_75] : memref<2x32x128xbf16, #tpu.memory_space<vmem>>, vector<1x32x128xbf16>
    %172 = vector.shape_cast %171 : vector<1x32x128xbf16> to vector<32x128xbf16>
    %cst_76 = arith.constant dense<0.000000e+00> : vector<8x128xf32>
    %173 = tpu.matmul %170, %172, %cst_76 {dimension_numbers = #tpu.dot_dimension_numbers<[1], [0], [0], [1], [0, 0, 1, 1], [], []>} : vector<8x32xbf16>, vector<32x128xbf16>, vector<8x128xf32> -> vector<8x128xf32>
    %174 = vector.extract_strided_slice %173 {offsets = [0, 0], sizes = [8, 32], strides = [1, 1]} : vector<8x128xf32> to vector<8x32xf32>
    %175 = vector.extract_strided_slice %173 {offsets = [0, 32], sizes = [8, 32], strides = [1, 1]} : vector<8x128xf32> to vector<8x32xf32>
    %176 = vector.extract_strided_slice %173 {offsets = [0, 64], sizes = [8, 32], strides = [1, 1]} : vector<8x128xf32> to vector<8x32xf32>
    %177 = arith.truncf %176 : vector<8x32xf32> to vector<8x32xbf16>
    %178 = arith.mulf %174, %9 : vector<8x32xf32>
    %179 = arith.truncf %174 : vector<8x32xf32> to vector<8x32xbf16>
    %cst_77 = arith.constant dense<0.000000e+00> : vector<8x32xf32>
    %180 = tpu.matmul %179, %12, %cst_77 {dimension_numbers = #tpu.dot_dimension_numbers<[1], [0], [0], [1], [0, 0, 1, 1], [], []>} : vector<8x32xbf16>, vector<32x32xbf16>, vector<8x32xf32> -> vector<8x32xf32>
    %181 = arith.mulf %180, %10 : vector<8x32xf32>
    %182 = arith.addf %178, %181 : vector<8x32xf32>
    %183 = arith.truncf %182 : vector<8x32xf32> to vector<8x32xbf16>
    %184 = arith.mulf %175, %9 : vector<8x32xf32>
    %185 = arith.truncf %175 : vector<8x32xf32> to vector<8x32xbf16>
    %cst_78 = arith.constant dense<0.000000e+00> : vector<8x32xf32>
    %186 = tpu.matmul %185, %12, %cst_78 {dimension_numbers = #tpu.dot_dimension_numbers<[1], [0], [0], [1], [0, 0, 1, 1], [], []>} : vector<8x32xbf16>, vector<32x32xbf16>, vector<8x32xf32> -> vector<8x32xf32>
    %187 = arith.mulf %186, %10 : vector<8x32xf32>
    %188 = arith.addf %184, %187 : vector<8x32xf32>
    %189 = arith.truncf %188 : vector<8x32xf32> to vector<8x32xbf16>
    %cst_79 = arith.constant 0.000000e+00 : f32
    %190 = vector.broadcast %cst_79 : f32 to vector<8x32xf32>
    %191 = vector.extract_strided_slice %183 {offsets = [0, 0], sizes = [8, 8], strides = [1, 1]} : vector<8x32xbf16> to vector<8x8xbf16>
    %192 = vector.extract_strided_slice %189 {offsets = [0, 0], sizes = [8, 8], strides = [1, 1]} : vector<8x32xbf16> to vector<8x8xbf16>
    %193 = vector.extract_strided_slice %177 {offsets = [0, 0], sizes = [8, 8], strides = [1, 1]} : vector<8x32xbf16> to vector<8x8xbf16>
    %194 = tpu.transpose %192, [1, 0] : vector<8x8xbf16> -> vector<8x8xbf16>
    %cst_80 = arith.constant dense<0.000000e+00> : vector<8x8xf32>
    %195 = tpu.matmul %191, %194, %cst_80 {dimension_numbers = #tpu.dot_dimension_numbers<[1], [0], [0], [1], [0, 0, 1, 1], [], []>} : vector<8x8xbf16>, vector<8x8xbf16>, vector<8x8xf32> -> vector<8x8xf32>
    %196 = arith.addf %195, %11 : vector<8x8xf32>
    %197 = math.exp %196 : vector<8x8xf32>
    %cst_81 = arith.constant dense<0.000000e+00> : vector<8xf32>
    %198 = vector.multi_reduction <add>, %197, %cst_81 [1] : vector<8x8xf32> to vector<8xf32>
    %199 = vector.shape_cast %198 : vector<8xf32> to vector<8x1xf32>
    %200 = vector.broadcast %199 : vector<8x1xf32> to vector<8x8xf32>
    %201 = arith.divf %197, %200 : vector<8x8xf32>
    %202 = arith.truncf %201 : vector<8x8xf32> to vector<8x8xbf16>
    %cst_82 = arith.constant dense<0.000000e+00> : vector<8x8xf32>
    %203 = tpu.matmul %202, %193, %cst_82 {dimension_numbers = #tpu.dot_dimension_numbers<[1], [0], [0], [1], [0, 0, 1, 1], [], []>} : vector<8x8xbf16>, vector<8x8xbf16>, vector<8x8xf32> -> vector<8x8xf32>
    %204 = arith.truncf %203 : vector<8x8xf32> to vector<8x8xbf16>
    %c1_83 = arith.constant 1 : index
    %c0_84 = arith.constant 0 : index
    %c0_85 = arith.constant 0 : index
    %c0_86 = arith.constant 0 : index
    %205 = vector.load %arg9[%c1_83, %c0_84, %c0_85, %c0_86] : memref<2x4x8x32xbf16, #tpu.memory_space<vmem>>, vector<1x1x8x32xbf16>
    %206 = vector.shape_cast %205 : vector<1x1x8x32xbf16> to vector<8x32xbf16>
    %cst_87 = arith.constant dense<0.000000e+00> : vector<8x32xf32>
    %207 = tpu.matmul %204, %206, %cst_87 {dimension_numbers = #tpu.dot_dimension_numbers<[1], [0], [0], [1], [0, 0, 1, 1], [], []>} : vector<8x8xbf16>, vector<8x32xbf16>, vector<8x32xf32> -> vector<8x32xf32>
    %208 = arith.addf %190, %207 : vector<8x32xf32>
    %209 = vector.extract_strided_slice %183 {offsets = [0, 8], sizes = [8, 8], strides = [1, 1]} : vector<8x32xbf16> to vector<8x8xbf16>
    %210 = vector.extract_strided_slice %189 {offsets = [0, 8], sizes = [8, 8], strides = [1, 1]} : vector<8x32xbf16> to vector<8x8xbf16>
    %211 = vector.extract_strided_slice %177 {offsets = [0, 8], sizes = [8, 8], strides = [1, 1]} : vector<8x32xbf16> to vector<8x8xbf16>
    %212 = tpu.transpose %210, [1, 0] : vector<8x8xbf16> -> vector<8x8xbf16>
    %cst_88 = arith.constant dense<0.000000e+00> : vector<8x8xf32>
    %213 = tpu.matmul %209, %212, %cst_88 {dimension_numbers = #tpu.dot_dimension_numbers<[1], [0], [0], [1], [0, 0, 1, 1], [], []>} : vector<8x8xbf16>, vector<8x8xbf16>, vector<8x8xf32> -> vector<8x8xf32>
    %214 = arith.addf %213, %11 : vector<8x8xf32>
    %215 = math.exp %214 : vector<8x8xf32>
    %cst_89 = arith.constant dense<0.000000e+00> : vector<8xf32>
    %216 = vector.multi_reduction <add>, %215, %cst_89 [1] : vector<8x8xf32> to vector<8xf32>
    %217 = vector.shape_cast %216 : vector<8xf32> to vector<8x1xf32>
    %218 = vector.broadcast %217 : vector<8x1xf32> to vector<8x8xf32>
    %219 = arith.divf %215, %218 : vector<8x8xf32>
    %220 = arith.truncf %219 : vector<8x8xf32> to vector<8x8xbf16>
    %cst_90 = arith.constant dense<0.000000e+00> : vector<8x8xf32>
    %221 = tpu.matmul %220, %211, %cst_90 {dimension_numbers = #tpu.dot_dimension_numbers<[1], [0], [0], [1], [0, 0, 1, 1], [], []>} : vector<8x8xbf16>, vector<8x8xbf16>, vector<8x8xf32> -> vector<8x8xf32>
    %222 = arith.truncf %221 : vector<8x8xf32> to vector<8x8xbf16>
    %c1_91 = arith.constant 1 : index
    %c1_92 = arith.constant 1 : index
    %c0_93 = arith.constant 0 : index
    %c0_94 = arith.constant 0 : index
    %223 = vector.load %arg9[%c1_91, %c1_92, %c0_93, %c0_94] : memref<2x4x8x32xbf16, #tpu.memory_space<vmem>>, vector<1x1x8x32xbf16>
    %224 = vector.shape_cast %223 : vector<1x1x8x32xbf16> to vector<8x32xbf16>
    %cst_95 = arith.constant dense<0.000000e+00> : vector<8x32xf32>
    %225 = tpu.matmul %222, %224, %cst_95 {dimension_numbers = #tpu.dot_dimension_numbers<[1], [0], [0], [1], [0, 0, 1, 1], [], []>} : vector<8x8xbf16>, vector<8x32xbf16>, vector<8x32xf32> -> vector<8x32xf32>
    %226 = arith.addf %208, %225 : vector<8x32xf32>
    %227 = vector.extract_strided_slice %183 {offsets = [0, 16], sizes = [8, 8], strides = [1, 1]} : vector<8x32xbf16> to vector<8x8xbf16>
    %228 = vector.extract_strided_slice %189 {offsets = [0, 16], sizes = [8, 8], strides = [1, 1]} : vector<8x32xbf16> to vector<8x8xbf16>
    %229 = vector.extract_strided_slice %177 {offsets = [0, 16], sizes = [8, 8], strides = [1, 1]} : vector<8x32xbf16> to vector<8x8xbf16>
    %230 = tpu.transpose %228, [1, 0] : vector<8x8xbf16> -> vector<8x8xbf16>
    %cst_96 = arith.constant dense<0.000000e+00> : vector<8x8xf32>
    %231 = tpu.matmul %227, %230, %cst_96 {dimension_numbers = #tpu.dot_dimension_numbers<[1], [0], [0], [1], [0, 0, 1, 1], [], []>} : vector<8x8xbf16>, vector<8x8xbf16>, vector<8x8xf32> -> vector<8x8xf32>
    %232 = arith.addf %231, %11 : vector<8x8xf32>
    %233 = math.exp %232 : vector<8x8xf32>
    %cst_97 = arith.constant dense<0.000000e+00> : vector<8xf32>
    %234 = vector.multi_reduction <add>, %233, %cst_97 [1] : vector<8x8xf32> to vector<8xf32>
    %235 = vector.shape_cast %234 : vector<8xf32> to vector<8x1xf32>
    %236 = vector.broadcast %235 : vector<8x1xf32> to vector<8x8xf32>
    %237 = arith.divf %233, %236 : vector<8x8xf32>
    %238 = arith.truncf %237 : vector<8x8xf32> to vector<8x8xbf16>
    %cst_98 = arith.constant dense<0.000000e+00> : vector<8x8xf32>
    %239 = tpu.matmul %238, %229, %cst_98 {dimension_numbers = #tpu.dot_dimension_numbers<[1], [0], [0], [1], [0, 0, 1, 1], [], []>} : vector<8x8xbf16>, vector<8x8xbf16>, vector<8x8xf32> -> vector<8x8xf32>
    %240 = arith.truncf %239 : vector<8x8xf32> to vector<8x8xbf16>
    %c1_99 = arith.constant 1 : index
    %c2_100 = arith.constant 2 : index
    %c0_101 = arith.constant 0 : index
    %c0_102 = arith.constant 0 : index
    %241 = vector.load %arg9[%c1_99, %c2_100, %c0_101, %c0_102] : memref<2x4x8x32xbf16, #tpu.memory_space<vmem>>, vector<1x1x8x32xbf16>
    %242 = vector.shape_cast %241 : vector<1x1x8x32xbf16> to vector<8x32xbf16>
    %cst_103 = arith.constant dense<0.000000e+00> : vector<8x32xf32>
    %243 = tpu.matmul %240, %242, %cst_103 {dimension_numbers = #tpu.dot_dimension_numbers<[1], [0], [0], [1], [0, 0, 1, 1], [], []>} : vector<8x8xbf16>, vector<8x32xbf16>, vector<8x32xf32> -> vector<8x32xf32>
    %244 = arith.addf %226, %243 : vector<8x32xf32>
    %245 = vector.extract_strided_slice %183 {offsets = [0, 24], sizes = [8, 8], strides = [1, 1]} : vector<8x32xbf16> to vector<8x8xbf16>
    %246 = vector.extract_strided_slice %189 {offsets = [0, 24], sizes = [8, 8], strides = [1, 1]} : vector<8x32xbf16> to vector<8x8xbf16>
    %247 = vector.extract_strided_slice %177 {offsets = [0, 24], sizes = [8, 8], strides = [1, 1]} : vector<8x32xbf16> to vector<8x8xbf16>
    %248 = tpu.transpose %246, [1, 0] : vector<8x8xbf16> -> vector<8x8xbf16>
    %cst_104 = arith.constant dense<0.000000e+00> : vector<8x8xf32>
    %249 = tpu.matmul %245, %248, %cst_104 {dimension_numbers = #tpu.dot_dimension_numbers<[1], [0], [0], [1], [0, 0, 1, 1], [], []>} : vector<8x8xbf16>, vector<8x8xbf16>, vector<8x8xf32> -> vector<8x8xf32>
    %250 = arith.addf %249, %11 : vector<8x8xf32>
    %251 = math.exp %250 : vector<8x8xf32>
    %cst_105 = arith.constant dense<0.000000e+00> : vector<8xf32>
    %252 = vector.multi_reduction <add>, %251, %cst_105 [1] : vector<8x8xf32> to vector<8xf32>
    %253 = vector.shape_cast %252 : vector<8xf32> to vector<8x1xf32>
    %254 = vector.broadcast %253 : vector<8x1xf32> to vector<8x8xf32>
    %255 = arith.divf %251, %254 : vector<8x8xf32>
    %256 = arith.truncf %255 : vector<8x8xf32> to vector<8x8xbf16>
    %cst_106 = arith.constant dense<0.000000e+00> : vector<8x8xf32>
    %257 = tpu.matmul %256, %247, %cst_106 {dimension_numbers = #tpu.dot_dimension_numbers<[1], [0], [0], [1], [0, 0, 1, 1], [], []>} : vector<8x8xbf16>, vector<8x8xbf16>, vector<8x8xf32> -> vector<8x8xf32>
    %258 = arith.truncf %257 : vector<8x8xf32> to vector<8x8xbf16>
    %c1_107 = arith.constant 1 : index
    %c3_108 = arith.constant 3 : index
    %c0_109 = arith.constant 0 : index
    %c0_110 = arith.constant 0 : index
    %259 = vector.load %arg9[%c1_107, %c3_108, %c0_109, %c0_110] : memref<2x4x8x32xbf16, #tpu.memory_space<vmem>>, vector<1x1x8x32xbf16>
    %260 = vector.shape_cast %259 : vector<1x1x8x32xbf16> to vector<8x32xbf16>
    %cst_111 = arith.constant dense<0.000000e+00> : vector<8x32xf32>
    %261 = tpu.matmul %258, %260, %cst_111 {dimension_numbers = #tpu.dot_dimension_numbers<[1], [0], [0], [1], [0, 0, 1, 1], [], []>} : vector<8x8xbf16>, vector<8x32xbf16>, vector<8x32xf32> -> vector<8x32xf32>
    %262 = arith.addf %244, %261 : vector<8x32xf32>
    %263 = arith.addf %154, %262 : vector<8x32xf32>
    %264 = vector.extract_strided_slice %156 {offsets = [1, 0], sizes = [1, 32], strides = [1, 1]} : vector<2x32xf32> to vector<1x32xf32>
    %265 = arith.mulf %263, %263 : vector<8x32xf32>
    %cst_112 = arith.constant dense<0.000000e+00> : vector<8xf32>
    %266 = vector.multi_reduction <add>, %265, %cst_112 [1] : vector<8x32xf32> to vector<8xf32>
    %267 = vector.shape_cast %266 : vector<8xf32> to vector<8x1xf32>
    %cst_113 = arith.constant 3.200000e+01 : f32
    %268 = vector.broadcast %cst_113 : f32 to vector<8x1xf32>
    %269 = arith.divf %267, %268 : vector<8x1xf32>
    %cst_114 = arith.constant 9.99999997E-7 : f32
    %270 = vector.broadcast %cst_114 : f32 to vector<8x1xf32>
    %271 = arith.addf %269, %270 : vector<8x1xf32>
    %272 = math.rsqrt %271 : vector<8x1xf32>
    %273 = vector.broadcast %272 : vector<8x1xf32> to vector<8x32xf32>
    %274 = arith.mulf %263, %273 : vector<8x32xf32>
    %275 = vector.broadcast %264 : vector<1x32xf32> to vector<8x32xf32>
    %276 = arith.mulf %274, %275 : vector<8x32xf32>
    %277 = arith.truncf %276 : vector<8x32xf32> to vector<8x32xbf16>
    %c1_115 = arith.constant 1 : index
    %c0_116 = arith.constant 0 : index
    %c0_117 = arith.constant 0 : index
    %278 = vector.load %arg10[%c1_115, %c0_116, %c0_117] : memref<2x32x128xbf16, #tpu.memory_space<vmem>>, vector<1x32x128xbf16>
    %279 = vector.shape_cast %278 : vector<1x32x128xbf16> to vector<32x128xbf16>
    %cst_118 = arith.constant dense<0.000000e+00> : vector<8x128xf32>
    %280 = tpu.matmul %277, %279, %cst_118 {dimension_numbers = #tpu.dot_dimension_numbers<[1], [0], [0], [1], [0, 0, 1, 1], [], []>} : vector<8x32xbf16>, vector<32x128xbf16>, vector<8x128xf32> -> vector<8x128xf32>
    %281 = vector.extract_strided_slice %280 {offsets = [0, 0], sizes = [8, 64], strides = [1, 1]} : vector<8x128xf32> to vector<8x64xf32>
    %282 = vector.extract_strided_slice %280 {offsets = [0, 64], sizes = [8, 64], strides = [1, 1]} : vector<8x128xf32> to vector<8x64xf32>
    %cst_119 = arith.constant 0.000000e+00 : f32
    %283 = vector.broadcast %cst_119 : f32 to vector<8x64xf32>
    %284 = arith.subf %283, %281 : vector<8x64xf32>
    %285 = math.exp %284 : vector<8x64xf32>
    %cst_120 = arith.constant 1.000000e+00 : f32
    %286 = vector.broadcast %cst_120 : f32 to vector<8x64xf32>
    %287 = arith.addf %286, %285 : vector<8x64xf32>
    %cst_121 = arith.constant 1.000000e+00 : f32
    %288 = vector.broadcast %cst_121 : f32 to vector<8x64xf32>
    %289 = arith.divf %288, %287 : vector<8x64xf32>
    %290 = arith.mulf %281, %289 : vector<8x64xf32>
    %291 = arith.mulf %290, %282 : vector<8x64xf32>
    %292 = arith.truncf %291 : vector<8x64xf32> to vector<8x64xbf16>
    %c1_122 = arith.constant 1 : index
    %c0_123 = arith.constant 0 : index
    %c0_124 = arith.constant 0 : index
    %293 = vector.load %arg11[%c1_122, %c0_123, %c0_124] : memref<2x64x32xbf16, #tpu.memory_space<vmem>>, vector<1x64x32xbf16>
    %294 = vector.shape_cast %293 : vector<1x64x32xbf16> to vector<64x32xbf16>
    %cst_125 = arith.constant dense<0.000000e+00> : vector<8x32xf32>
    %295 = tpu.matmul %292, %294, %cst_125 {dimension_numbers = #tpu.dot_dimension_numbers<[1], [0], [0], [1], [0, 0, 1, 1], [], []>} : vector<8x64xbf16>, vector<64x32xbf16>, vector<8x32xf32> -> vector<8x32xf32>
    %296 = arith.addf %263, %295 : vector<8x32xf32>
    %c0_126 = arith.constant 0 : index
    %c0_127 = arith.constant 0 : index
    %297 = vector.load %arg6[%c0_126, %c0_127] : memref<1x32xf32, #tpu.memory_space<vmem>>, vector<1x32xf32>
    %298 = arith.mulf %296, %296 : vector<8x32xf32>
    %cst_128 = arith.constant dense<0.000000e+00> : vector<8xf32>
    %299 = vector.multi_reduction <add>, %298, %cst_128 [1] : vector<8x32xf32> to vector<8xf32>
    %300 = vector.shape_cast %299 : vector<8xf32> to vector<8x1xf32>
    %cst_129 = arith.constant 3.200000e+01 : f32
    %301 = vector.broadcast %cst_129 : f32 to vector<8x1xf32>
    %302 = arith.divf %300, %301 : vector<8x1xf32>
    %cst_130 = arith.constant 9.99999997E-7 : f32
    %303 = vector.broadcast %cst_130 : f32 to vector<8x1xf32>
    %304 = arith.addf %302, %303 : vector<8x1xf32>
    %305 = math.rsqrt %304 : vector<8x1xf32>
    %306 = vector.broadcast %305 : vector<8x1xf32> to vector<8x32xf32>
    %307 = arith.mulf %296, %306 : vector<8x32xf32>
    %308 = vector.broadcast %297 : vector<1x32xf32> to vector<8x32xf32>
    %309 = arith.mulf %307, %308 : vector<8x32xf32>
    %c0_131 = arith.constant 0 : index
    %c0_132 = arith.constant 0 : index
    %310 = vector.load %arg12[%c0_131, %c0_132] : memref<8x32xf32, #tpu.memory_space<vmem>>, vector<8x32xf32>
    tpu.vector_store %arg12[%c0_131, %c0_132], %309 {strides = array<i32>} : memref<8x32xf32, #tpu.memory_space<vmem>>, vector<8x32xf32>,
    return
  }
}

</mosaic_0001>

<bundles_post_ra>
// kernel: tile.14
= control target key start
LH: loop header
LB: loop body
LE: loop exit
PB: predicated region body
PF: predicated region fallthrough
CT: control target
= control target key end

     0   :  { %vm42_vm0 = vcmask 1047556   ;;  %vm44_vm1 = vcmask 64512   ;;  %s93_s22 = smov 8   ;;  %s94_s25 = smov 16   ;;  %vm54_vm2 = vcmask 261312   ;;  %vm64_vm3 = vcmask 195712   ;;  %s146_s0 = inlined_call_operand.vmem [shape: f32[8,4,8], index: 0, kind: input, shape index: {}]   ;;  %s147_s1 = inlined_call_operand.vmem [shape: f32[8,32], index: 1, kind: output, shape index: {}]  }
   0x1   :  { %v82_v0 = vld [vmem:[%s146_s0 + $0x1c] sm:$0xf]  ;;  %v83_v1 = vld [vmem:[%s146_s0 + $0x18] sm:$0xf]  ;;  %v84_v2 = vld [vmem:[%s146_s0 + $0x14] sm:$0xf] }
   0x2   :  { %8 = vst [vmem:[#allocation0 + $0x38] sm:$0xf] %v82_v0  ;;  %13 = vst [vmem:[#allocation0 + $0x30] sm:$0xf] %v83_v1  ;;  %v85_v3 = vld [vmem:[%s146_s0 + $0x10] sm:$0xf] }
   0x3   :  { %18 = vst [vmem:[#allocation0 + $0x28] sm:$0xf] %v84_v2  ;;  %v86_v4 = vld [vmem:[%s146_s0 + $0xc] sm:$0xf]  ;;  %v87_v5 = vld [vmem:[%s146_s0 + $0x8] sm:$0xf] }
   0x4   :  { %23 = vst [vmem:[#allocation0 + $0x20] sm:$0xf] %v85_v3  ;;  %28 = vst [vmem:[#allocation0 + $0x18] sm:$0xf] %v86_v4  ;;  %v88_v6 = vld [vmem:[%s146_s0 + $0x4] sm:$0xf] }
   0x5   :  { %33 = vst [vmem:[#allocation0 + $0x10] sm:$0xf] %v87_v5  ;;  %v38_v7 = vld [vmem:[%s146_s0] sm:$0xf]  ;;  %37 = vst [vmem:[#allocation0 + $0x8] sm:$0xf] %v88_v6 }
   0x6   :  { %39 = vst [vmem:[#allocation0] sm:$0xf] %v38_v7  ;;  %s92_s0 = smov 24   ;;  %vm74_vm4 = vcmask 130112  }
   0xb   :  { %v49_v8 = vld [vmem:[#allocation0 + $0x3] ss:$8 sm:$0xf0]   ;;  %v59_v9 = vld [vmem:[#allocation0 + $0x2] ss:$8 sm:$0xf0]  }
   0xc   :  { %v69_v14 = vld [vmem:[#allocation0 + $0x1] ss:$8 sm:$0xf0]   ;;  %v41_v17 = vld [vmem:[#allocation0] ss:$8 sm:$0xf0]  }
   0xd   :  { %v47_v10 = vld [vmem:[#allocation0 + $0x3] ss:$8 sm:$0xf]   ;;  %v57_v11 = vld [vmem:[#allocation0 + $0x2] ss:$8 sm:$0xf]  }
   0xe   :  { %v51_v12 = vsel %vm42_vm0, %v49_v8, %v47_v10  ;;  %v67_v13 = vld [vmem:[#allocation0 + $0x1] ss:$8 sm:$0xf]   ;;  %v40_v16 = vld [vmem:[#allocation0] ss:$8 sm:$0xf]   ;;  %v61_v18 = vsel %vm42_vm0, %v59_v9, %v57_v11 }
   0xf   :  { %52 = vrot.lane.b32.xlu0 %v51_v12, %s92_s0  ;;  %v71_v15 = vsel %vm42_vm0, %v69_v14, %v67_v13  ;;  %v43_v19 = vsel %vm42_vm0, %v41_v17, %v40_v16 }
  0x10   :  { %72 = vrot.lane.b32.xlu1 %v71_v15, %s93_s22  ;;  %45 = vst.msk [vmem:[%s147_s1] sm:$0xff] %vm44_vm1, %v43_v19  }
  0x13   :  { %62 = vrot.lane.b32.xlu0 %v61_v18, %s94_s25 }
  0x81   :  { %v53_v20 = vpop.permute.xlu0 %52  }
  0x82   :  { %55 = vst.msk [vmem:[%s147_s1] sm:$0xff] %vm54_vm2, %v53_v20   ;;  %v73_v21 = vpop.permute.xlu1 %72  }
  0x85   :  { %v63_v22 = vpop.permute.xlu0 %62  }
  0x86   :  { %65 = vst.msk [vmem:[%s147_s1] sm:$0xff] %vm64_vm3, %v63_v22  }
  0x87   :  { %75 = vst.msk [vmem:[%s147_s1] sm:$0xff] %vm74_vm4, %v73_v21  }

// kernel: llama_embedding_forward.1
= control target key start
LH: loop header
LB: loop body
LE: loop exit
PB: predicated region body
PF: predicated region fallthrough
CT: control target
= control target key end

     0   :  { %v2654_v0 = vmov 0   ;;  %v2655_v2 = vmov 0.0   ;;  %v43_v5 = vlaneseq  ;;  %vm2656_vm0 = vmmov 0   ;;  %s2658_s29 = smov 64   ;;  %s2659_s30 = smov 96   ;;  %s3194_s0 = inlined_call_operand.vmem [shape: s32[8,1], index: 0, kind: input, shape index: {}]   ;;  %s3195_s1 = inlined_call_operand.vmem [shape: bf16[128,32], index: 1, kind: input, shape index: {}]   ;;  %s3196_s7 = inlined_call_operand.vmem [shape: f32[2,2,32], index: 7, kind: input, shape index: {}]   ;;  %s3197_s8 = inlined_call_operand.vmem [shape: bf16[2,32,128], index: 8, kind: input, shape index: {}]   ;;  %s3198_s5 = inlined_call_operand.vmem [shape: bf16[32,32], index: 5, kind: input, shape index: {}]   ;;  %s3199_s2 = inlined_call_operand.vmem [shape: f32[8,32], index: 2, kind: input, shape index: {}]   ;;  %s3200_s3 = inlined_call_operand.vmem [shape: f32[8,32], index: 3, kind: input, shape index: {}]   ;;  %s3201_s4 = inlined_call_operand.vmem [shape: f32[8,8], index: 4, kind: input, shape index: {}]   ;;  %s3202_s9 = inlined_call_operand.vmem [shape: bf16[2,4,8,32], index: 9, kind: input, shape index: {}]   ;;  %s3203_s10 = inlined_call_operand.vmem [shape: bf16[2,32,128], index: 10, kind: input, shape index: {}]   ;;  %s3204_s11 = inlined_call_operand.vmem [shape: bf16[2,64,32], index: 11, kind: input, shape index: {}]   ;;  %s3205_s6 = inlined_call_operand.vmem [shape: f32[1,32], index: 6, kind: input, shape index: {}]   ;;  %s3206_s12 = inlined_call_operand.vmem [shape: f32[8,32], index: 12, kind: output, shape index: {}]  }
   0x1   :  { %2577 = vset.pattern.permute.xlu0 %v2654_v0  ;;  %v42_v1 = vld [vmem:[%s3194_s0] sm:$0xff]  ;;  %2309 = vmatprep.subr.bf16.mxu0 %v2655_v2  ;;  %v2579_v4 = vld [vmem:[%s3195_s1 + $0x8] sm:$0xff]   ;;  %v2580_v7 = vld [vmem:[%s3195_s1 + $0x10] sm:$0xff]   ;;  %v2657_v18 = vmov 1.0|1.0   ;;  %vm165_vm3 = vcmask 261120  }
   0x2   :  { %46 = vperm.xlu0 %2577, %v42_v1   ;;  %v2578_v3 = vld [vmem:[%s3195_s1] sm:$0xff]   ;;  %2329 = vmatprep.subr.bf16.mxu1 %v2655_v2  ;;  %v2749_v6 = vshrl.u32 %v43_v5, 7  ;;  %v2581_v11 = vld [vmem:[%s3195_s1 + $0x18] sm:$0xff]   ;;  %v2583_v13 = vld [vmem:[%s3195_s1 + $0x28] sm:$0xff]   ;;  %v44_v16 = vand.u32 127, %v43_v5  ;;  %s2660_s14 = smov 32  }
   0x3   :  { %2310 = vmatpush3.bf16.msra.mxu0 %v2578_v3  ;;  %2325 = vmatprep.mubr.msk.bf16.mxu0 %vm2656_vm0, %v2655_v2  ;;  %v2761_v9 = vld [vmem:[%s3196_s7 + $0x2] sm:$0x3]  ;;  %v2584_v14 = vld [vmem:[%s3195_s1 + $0x30] sm:$0xff]   ;;  %v2585_v15 = vld [vmem:[%s3195_s1 + $0x38] sm:$0xff]   ;;  %vm360_vm4 = vcmask 64512   ;;  %vm420_vm5 = vcmask 1043456  }
   0x4   :  { %2311 = vmatprep.subr.bf16.mxu0 %v2655_v2  ;;  %2333 = vmatprep.mubr.msk.bf16.mxu1 %vm2656_vm0, %v2655_v2  ;;  %v991_v8 = vsub.s32 1, %v2749_v6  ;;  %v2582_v12 = vld [vmem:[%s3195_s1 + $0x20] sm:$0xff]   ;;  %v2587_v26 = vld [vmem:[%s3197_s8 + $0x8] sm:$0xff]   ;;  %v176_v30 = vsub.s32 0, %v2749_v6  ;;  %s2662_s18 = smov 88   ;;  %s2663_s19 = smov 56  }
   0x5   :  { %v2586_v25 = vld [vmem:[%s3197_s8] sm:$0xff]   ;;  %v2827_v38 = vld [vmem:[%s3198_s5 + $0x8] sm:$0xff]   ;;  %s2665_s20 = smov 112   ;;  %s2666_s21 = smov 48   ;;  %vm1099_vm6 = vcmask 523264  }
   0x6   :  { %v2766_v10 = vrot.slane %v2761_v9, %v991_v8  ;;  %2330 = vmatpush3.bf16.msra.mxu1 %v2586_v25  ;;  %v2808_v31 = vld [vmem:[%s3196_s7] sm:$0x3]  ;;  %s2667_s1 = smov 72   ;;  %s2668_s26 = smov 104  }
   0x7   :  { %2312 = vmatpush3.bf16.msra.mxu0 %v2579_v4  ;;  %2331 = vmatprep.subr.bf16.mxu1 %v2655_v2  ;;  %v177_v32 = vrot.slane %v2808_v31, %v176_v30  ;;  %v2817_v36 = vld [vmem:[%s3198_s5] sm:$0xff]   ;;  %s2669_s0 = smov 40  }
   0x8   :  { %2313 = vmatprep.subr.bf16.mxu0 %v2655_v2  ;;  %v2845_v44 = vld [vmem:[%s3199_s2] sm:$0xff]  ;;  %s2661_s2 = smov 120  }
   0x9   :  { %v2858_v46 = vld [vmem:[%s3200_s3] sm:$0xff] }
   0xa   :  { %2332 = vmatpush3.bf16.msra.mxu1 %v2587_v26 }
   0xb   :  { %2314 = vmatpush3.bf16.msra.mxu0 %v2580_v7  ;;  %2337 = vmatprep.subr.bf16.mxu1 %v2655_v2  ;;  %v2886_v7 = vld [vmem:[%s3201_s4] sm:$0xff]  ;;  %s2664_s4 = smov 80  }
   0xc   :  { %2315 = vmatprep.subr.bf16.mxu0 %v2655_v2 }
   0xf   :  { %2316 = vmatpush3.bf16.msra.mxu0 %v2581_v11 }
  0x10   :  { %2317 = vmatprep.subr.bf16.mxu0 %v2655_v2 }
  0x13   :  { %2318 = vmatpush3.bf16.msra.mxu0 %v2582_v12 }
  0x14   :  { %2319 = vmatprep.subr.bf16.mxu0 %v2655_v2 }
  0x17   :  { %2320 = vmatpush3.bf16.msra.mxu0 %v2583_v13 }
  0x18   :  { %2321 = vmatprep.subr.bf16.mxu0 %v2655_v2 }
  0x1b   :  { %2322 = vmatpush3.bf16.msra.mxu0 %v2584_v14 }
  0x1c   :  { %2323 = vmatprep.subr.bf16.mxu0 %v2655_v2 }
  0x1f   :  { %2324 = vmatpush3.bf16.msra.mxu0 %v2585_v15 }
  0x20   :  { %2371 = vmatprep.subr.bf16.mxu0 %v2655_v2 }
  0x81   :  { %v47_v17 = vpop.permute.xlu0 %46 }
  0x82   :  { %vm48_vm1 = vcmp.eq.s32.totalorder %v44_v16, %v47_v17 }
  0x83   :  { %vm2139_vm2 = vmpackc.low %vm48_vm1, %vm48_vm1 }
  0x84   :  { %2326 = vmatmul.mubr.msk.bf16.vlgmr.msra.gmra.mrb[0].mxu0 %vm2139_vm2, %v2657_v18 }
  0x85   :  { %2373 = vmatprep.mubr.msk.bf16.mxu0 %vm2656_vm0, %v2655_v2 }
 0x157   :  { %v2791_v19 = vpop.f32.mrb[0].mxu0 }
 0x158   :  { %v2327_v20 = vpop.f32.mrb[1].mxu0  ;;  %v164_v21 = vmul.f32 %v2791_v19, %v2791_v19 }
 0x159   :  { %v153_v22 = vpop.f32.mrb[2].mxu0 }
 0x15a   :  { %v2328_v23 = vpop.f32.mrb[3].mxu0  ;;  %v166_v24 = vsel %vm165_vm3, %v164_v21, 0.0 }
 0x15b   :  { %167 = vadd.xlane.f32.xlu0 %v166_v24 }
 0x1e8   :  { %v168_v27 = vpop.xlane.xlu0 %167 }
 0x1e9   :  { %v170_v28 = vmul.f32 0.03125, %v168_v27 }
 0x1eb   :  { %v171_v29 = vadd.f32 1e-06, %v170_v28 }
 0x1ed   :  { %2604 = vrsqrt.f32 %v171_v29 }
 0x1f7   :  { %v2605_v33 = vpop.eup %2604 }
 0x1f8   :  { %v173_v34 = vmul.f32 %v2605_v33, %v2791_v19 }
 0x1fa   :  { %v178_v35 = vmul.f32 %v177_v32, %v173_v34 }
 0x1fc   :  { %v179_v37 = vpack.c.bf16 %v178_v35, %v178_v35 }
 0x1fe   :  { %2334 = vmatmul.mubr.msk.bf16.vlgmr.msra.gmra.mrb[0].mxu1 %vm165_vm3, %v179_v37 }
 0x1ff   :  { %2338 = vmatpush3.bf16.msra.mxu1 %v2817_v36  ;;  %2341 = vmatprep.mubr.msk.bf16.mxu1 %vm2656_vm0, %v2655_v2 }
 0x200   :  { %2339 = vmatprep.subr.bf16.mxu1 %v2655_v2 }
 0x203   :  { %2340 = vmatpush3.bf16.msra.mxu1 %v2827_v38 }
 0x204   :  { %2345 = vmatprep.subr.bf16.mxu1 %v2655_v2 }
 0x2d1   :  { %v233_v39 = vpop.f32.mrb[0].mxu1 }
 0x2d2   :  { %v2831_v40 = vpack.c.bf16 %v233_v39, %v233_v39  ;;  %v2335_v41 = vpop.f32.mrb[1].mxu1  ;;  %v240_v48 = vmul.f32 %v233_v39, %v2845_v44 }
 0x2d3   :  { %v236_v42 = vpop.f32.mrb[2].mxu1 }
 0x2d4   :  { %415 = vrot.lane.b32.xlu0 %v2831_v40, %s2658_s29  ;;  %305 = vrot.lane.b32.xlu1 %v2831_v40, %s2659_s30  ;;  %v2336_v43 = vpop.f32.mrb[3].mxu1 }
 0x2d5   :  { %2342 = vmatmul.mubr.msk.bf16.vlgmr.msra.gmra.mrb[4].mxu1 %vm165_vm3, %v2831_v40 }
 0x2d6   :  { %2346 = vmatpush3.bf16.msra.mxu1 %v2817_v36  ;;  %2349 = vmatprep.mubr.msk.bf16.mxu1 %vm2656_vm0, %v2655_v2 }
 0x2d7   :  { %2347 = vmatprep.subr.bf16.mxu1 %v2655_v2 }
 0x2d8   :  { %300 = vrot.lane.b32.xlu1 %v2845_v44, %s2660_s14 }
 0x2da   :  { %2348 = vmatpush3.bf16.msra.mxu1 %v2827_v38 }
 0x2db   :  { %2353 = vmatprep.subr.bf16.mxu1 %v2655_v2 }
 0x346   :  { %v306_v45 = vpop.permute.xlu1 %305  ;;  %v416_v4 = vpop.permute.xlu0 %415 }
 0x347   :  { %2350 = vmatmul.mubr.msk.bf16.vlgmr.msra.gmra.mrb[8].mxu1 %vm165_vm3, %v306_v45  ;;  %v422_v5 = vsel %vm420_vm5, %v416_v4, 0 }
 0x348   :  { %2355 = vmatprep.mubr.msk.bf16.mxu1 %vm2656_vm0, %v2655_v2 }
 0x34a   :  { %v2868_v60 = vpop.permute.xlu1 %300 }
 0x34b   :  { %v303_v61 = vmul.f32 %v2868_v60, %v233_v39 }
 0x3a8   :  { %v290_v47 = vpop.f32.mrb[4].mxu1 }
 0x3a9   :  { %v296_v49 = vmul.f32 %v290_v47, %v2858_v46  ;;  %v2343_v50 = vpop.f32.mrb[5].mxu1 }
 0x3aa   :  { %v293_v51 = vpop.f32.mrb[6].mxu1 }
 0x3ab   :  { %v297_v52 = vadd.f32 %v296_v49, %v240_v48  ;;  %v2344_v53 = vpop.f32.mrb[7].mxu1  ;;  %v2152_v48 = vld [vmem:[%s3202_s9 + $0x4] sm:$0xf] }
 0x3ac   :  { %v580_v49 = vsel %vm420_vm5, %v2152_v48, 0 }
 0x3ad   :  { %v2862_v54 = vpack.c.bf16 %v297_v52, %v297_v52  ;;  %v465_v52 = vld [vmem:[%s3202_s9] sm:$0xf] }
 0x3af   :  { %467 = vrot.lane.b32.xlu0 %v2862_v54, %s2661_s2 }
 0x41a   :  { %v344_v55 = vpop.f32.mrb[8].mxu1 }
 0x41b   :  { %v350_v56 = vmul.f32 %v344_v55, %v2858_v46  ;;  %v2351_v57 = vpop.f32.mrb[9].mxu1 }
 0x41c   :  { %v347_v58 = vpop.f32.mrb[10].mxu1 }
 0x41d   :  { %352 = vrot.lane.b32.xlu1 %v350_v56, %s2660_s14  ;;  %v2352_v59 = vpop.f32.mrb[11].mxu1  ;;  %v626_v56 = vsel %vm420_vm5, %v465_v52, 0 }
 0x421   :  { %v468_v28 = vpop.permute.xlu0 %467 }
 0x48f   :  { %v353_v62 = vpop.permute.xlu1 %352 }
 0x490   :  { %v355_v63 = vadd.f32 %v353_v62, %v303_v61 }
 0x492   :  { %v2871_v0 = vpack.c.bf16 %v355_v63, %v355_v63 }
 0x494   :  { %358 = vrot.lane.b32.xlu1 %v2871_v0, %s2659_s30 }
 0x506   :  { %v359_v1 = vpop.permute.xlu1 %358 }
 0x507   :  { %v365_v3 = vsel %vm360_vm4, %v359_v1, 0 }
 0x508   :  { %2354 = vmatpush3.bf16.xpose.msra.mxu1 %v365_v3 }
 0x509   :  { %2359 = vmatprep.subr.bf16.mxu1 %v2655_v2 }
 0x50f   :  { %2356 = vmatmul.mubr.msk.bf16.vlgmr.msra.gmra.mrb[12].mxu1 %vm360_vm4, %v2862_v54 }
 0x510   :  { %2360 = vmatpush3.bf16.msra.mxu1 %v422_v5  ;;  %2361 = vmatprep.mubr.msk.bf16.mxu1 %vm2656_vm0, %v2655_v2 }
 0x511   :  { %2365 = vmatprep.subr.bf16.mxu1 %v2655_v2 }
 0x5e2   :  { %v401_v11 = vpop.f32.mrb[12].mxu1 }
 0x5e3   :  { %v402_v12 = vadd.f32 %v401_v11, %v2886_v7  ;;  %v2357_v13 = vpop.f32.mrb[13].mxu1 }
 0x5e4   :  { %v404_v14 = vpop.f32.mrb[14].mxu1 }
 0x5e5   :  { %v407_v15 = vmul.f32 1.442695, %v402_v12  ;;  %v2358_v16 = vpop.f32.mrb[15].mxu1 }
 0x5e7   :  { %2606 = vpow2.f32 %v407_v15 }
 0x5f1   :  { %v2607_v17 = vpop.eup %2606 }
 0x5f2   :  { %v409_v18 = vsel %vm360_vm4, %v2607_v17, 0.0 }
 0x5f3   :  { %410 = vadd.xlane.f32.xlu1 %v409_v18 }
 0x604   :  { %469 = vrot.lane.b32.xlu1 %v2871_v0, %s2662_s18 }
 0x608   :  { %525 = vrot.lane.b32.xlu1 %v2831_v40, %s2663_s19 }
 0x60c   :  { %670 = vrot.lane.b32.xlu1 %v2871_v0, %s2664_s4 }
 0x610   :  { %668 = vrot.lane.b32.xlu1 %v2862_v54, %s2665_s20 }
 0x680   :  { %v411_v20 = vpop.xlane.xlu1 %410 }
 0x681   :  { %2608 = vrcp.f32 %v411_v20 }
 0x684   :  { %v470_v21 = vpop.permute.xlu1 %469 }
 0x685   :  { %v475_v27 = vsel %vm360_vm4, %v470_v21, 0 }
 0x688   :  { %v526_v22 = vpop.permute.xlu1 %525 }
 0x689   :  { %v531_v23 = vsel %vm420_vm5, %v526_v22, 0 }
 0x68a   :  { %2372 = vmatpush3.bf16.msra.mxu0 %v531_v23 }
 0x68b   :  { %v2609_v24 = vpop.eup %2608  ;;  %2383 = vmatprep.subr.bf16.mxu0 %v2655_v2 }
 0x68c   :  { %v413_v25 = vmul.f32 %v2609_v24, %v2607_v17  ;;  %v671_v61 = vpop.permute.xlu1 %670 }
 0x68d   :  { %v676_v3 = vsel %vm360_vm4, %v671_v61, 0 }
 0x68e   :  { %v414_v26 = vpack.c.bf16 %v413_v25, %v413_v25 }
 0x690   :  { %2362 = vmatmul.mubr.msk.bf16.vlgmr.msra.gmra.mrb[16].mxu1 %vm360_vm4, %v414_v26  ;;  %v669_v12 = vpop.permute.xlu1 %668 }
 0x691   :  { %2366 = vmatpush3.bf16.xpose.msra.mxu1 %v475_v27  ;;  %2367 = vmatprep.mubr.msk.bf16.mxu1 %vm2656_vm0, %v2655_v2 }
 0x692   :  { %2377 = vmatprep.subr.bf16.mxu1 %v2655_v2 }
 0x698   :  { %2368 = vmatmul.mubr.msk.bf16.vlgmr.msra.gmra.mrb[20].mxu1 %vm360_vm4, %v468_v28 }
 0x699   :  { %2379 = vmatprep.mubr.msk.bf16.mxu1 %vm2656_vm0, %v2655_v2  ;;  %2378 = vmatpush3.bf16.msra.mxu1 %v580_v49 }
 0x69a   :  { %2389 = vmatprep.subr.bf16.mxu1 %v2655_v2 }
 0x763   :  { %v458_v29 = vpop.f32.mrb[16].mxu1 }
 0x764   :  { %v2363_v32 = vpop.f32.mrb[17].mxu1  ;;  %v464_v58 = vpack.c.bf16 %v458_v29, %v458_v29  ;;  %v2157_v29 = vld [vmem:[%s3202_s9 + $0x8] sm:$0xf] }
 0x765   :  { %v461_v33 = vpop.f32.mrb[18].mxu1  ;;  %v781_v32 = vsel %vm420_vm5, %v2157_v29, 0 }
 0x766   :  { %v2364_v34 = vpop.f32.mrb[19].mxu1 }
 0x76b   :  { %v511_v35 = vpop.f32.mrb[20].mxu1 }
 0x76c   :  { %v512_v37 = vadd.f32 %v511_v35, %v2886_v7  ;;  %v2369_v39 = vpop.f32.mrb[21].mxu1 }
 0x76d   :  { %v514_v41 = vpop.f32.mrb[22].mxu1 }
 0x76e   :  { %v517_v42 = vmul.f32 1.442695, %v512_v37  ;;  %v2370_v43 = vpop.f32.mrb[23].mxu1 }
 0x770   :  { %2610 = vpow2.f32 %v517_v42 }
 0x77a   :  { %v2611_v45 = vpop.eup %2610 }
 0x77b   :  { %v519_v47 = vsel %vm360_vm4, %v2611_v45, 0.0 }
 0x77c   :  { %520 = vadd.xlane.f32.xlu0 %v519_v47 }
 0x792   :  { %726 = vrot.lane.b32.xlu0 %v2831_v40, %s2666_s21 }
 0x796   :  { %826 = vrot.lane.b32.xlu0 %v2871_v0, %s2667_s1 }
 0x809   :  { %v521_v50 = vpop.xlane.xlu0 %520 }
 0x80a   :  { %2612 = vrcp.f32 %v521_v50 }
 0x80d   :  { %v727_v57 = vpop.permute.xlu0 %726 }
 0x80e   :  { %v732_v59 = vsel %vm420_vm5, %v727_v57, 0 }
 0x811   :  { %v827_v37 = vpop.permute.xlu0 %826 }
 0x814   :  { %v2613_v51 = vpop.eup %2612 }
 0x815   :  { %v523_v53 = vmul.f32 %v2613_v51, %v2611_v45 }
 0x817   :  { %v524_v55 = vpack.c.bf16 %v523_v53, %v523_v53 }
 0x819   :  { %2374 = vmatmul.mubr.msk.bf16.vlgmr.msra.gmra.mrb[4].mxu0 %vm360_vm4, %v524_v55 }
 0x81a   :  { %2384 = vmatpush3.bf16.msra.mxu0 %v626_v56  ;;  %2385 = vmatprep.mubr.msk.bf16.mxu0 %vm2656_vm0, %v2655_v2 }
 0x81b   :  { %2395 = vmatprep.subr.bf16.mxu0 %v2655_v2 }
 0x821   :  { %2386 = vmatmul.mubr.msk.bf16.vlgmr.msra.gmra.mrb[8].mxu0 %vm360_vm4, %v464_v58 }
 0x822   :  { %2396 = vmatpush3.bf16.msra.mxu0 %v732_v59  ;;  %2397 = vmatprep.mubr.msk.bf16.mxu0 %vm2656_vm0, %v2655_v2  ;;  %v2161_v59 = vld [vmem:[%s3202_s9 + $0xc] sm:$0xf] }
 0x823   :  { %2407 = vmatprep.subr.bf16.mxu0 %v2655_v2  ;;  %v937_v61 = vsel %vm420_vm5, %v2161_v59, 0 }
 0x8ec   :  { %v567_v62 = vpop.f32.mrb[4].mxu0 }
 0x8ed   :  { %v573_v63 = vpack.c.bf16 %v567_v62, %v567_v62  ;;  %v2375_v0 = vpop.f32.mrb[5].mxu0 }
 0x8ee   :  { %v570_v1 = vpop.f32.mrb[6].mxu0 }
 0x8ef   :  { %v2376_v4 = vpop.f32.mrb[7].mxu0  ;;  %2380 = vmatmul.mubr.msk.bf16.vlgmr.msra.gmra.mrb[24].mxu1 %vm360_vm4, %v573_v63 }
 0x8f0   :  { %2390 = vmatpush3.bf16.xpose.msra.mxu1 %v676_v3  ;;  %2391 = vmatprep.mubr.msk.bf16.mxu1 %vm2656_vm0, %v2655_v2 }
 0x8f1   :  { %2401 = vmatprep.subr.bf16.mxu1 %v2655_v2 }
 0x8f4   :  { %v662_v5 = vpop.f32.mrb[8].mxu0 }
 0x8f5   :  { %v2387_v11 = vpop.f32.mrb[9].mxu0 }
 0x8f6   :  { %v665_v13 = vpop.f32.mrb[10].mxu0 }
 0x8f7   :  { %v2388_v14 = vpop.f32.mrb[11].mxu0  ;;  %2392 = vmatmul.mubr.msk.bf16.vlgmr.msra.gmra.mrb[28].mxu1 %vm360_vm4, %v669_v12 }
 0x8f8   :  { %2403 = vmatprep.mubr.msk.bf16.mxu1 %vm2656_vm0, %v2655_v2  ;;  %2402 = vmatpush3.bf16.msra.mxu1 %v781_v32 }
 0x8f9   :  { %2413 = vmatprep.subr.bf16.mxu1 %v2655_v2 }
 0x9c2   :  { %v616_v15 = vpop.f32.mrb[24].mxu1 }
 0x9c3   :  { %v2940_v16 = vadd.f32 %v662_v5, %v616_v15  ;;  %v2381_v17 = vpop.f32.mrb[25].mxu1 }
 0x9c4   :  { %v619_v18 = vpop.f32.mrb[26].mxu1 }
 0x9c5   :  { %v2382_v20 = vpop.f32.mrb[27].mxu1 }
 0x9ca   :  { %v712_v21 = vpop.f32.mrb[28].mxu1 }
 0x9cb   :  { %v713_v22 = vadd.f32 %v712_v21, %v2886_v7  ;;  %v2393_v23 = vpop.f32.mrb[29].mxu1 }
 0x9cc   :  { %v715_v24 = vpop.f32.mrb[30].mxu1 }
 0x9cd   :  { %v718_v25 = vmul.f32 1.442695, %v713_v22  ;;  %v2394_v26 = vpop.f32.mrb[31].mxu1 }
 0x9cf   :  { %2614 = vpow2.f32 %v718_v25 }
 0x9d9   :  { %v2615_v27 = vpop.eup %2614 }
 0x9da   :  { %v720_v28 = vsel %vm360_vm4, %v2615_v27, 0.0 }
 0x9db   :  { %721 = vadd.xlane.f32.xlu1 %v720_v28  ;;  %v2591_v28 = vld [vmem:[%s3203_s10 + $0x8] sm:$0xff]  }
 0x9ec   :  { %824 = vrot.lane.b32.xlu1 %v2862_v54, %s2668_s26  ;;  %v832_v54 = vsel %vm360_vm4, %v827_v37, 0 }
 0x9f0   :  { %882 = vrot.lane.b32.xlu1 %v2831_v40, %s2669_s0 }
 0xa68   :  { %v722_v33 = vpop.xlane.xlu1 %721 }
 0xa69   :  { %2616 = vrcp.f32 %v722_v33  ;;  %v992_v33 = vrot.slane %v2808_v31, %v991_v8  ;;  %v2594_v8 = vld [vmem:[%s3204_s11 + $0x10] sm:$0xff]   ;;  %v2595_v31 = vld [vmem:[%s3204_s11 + $0x18] sm:$0xff]  }
 0xa6c   :  { %v825_v40 = vpop.permute.xlu1 %824 }
 0xa70   :  { %v883_v41 = vpop.permute.xlu1 %882 }
 0xa71   :  { %v888_v48 = vsel %vm420_vm5, %v883_v41, 0 }
 0xa73   :  { %v2617_v34 = vpop.eup %2616 }
 0xa74   :  { %v724_v35 = vmul.f32 %v2617_v34, %v2615_v27  ;;  %v2590_v27 = vld [vmem:[%s3203_s10] sm:$0xff]  }
 0xa76   :  { %v725_v39 = vpack.c.bf16 %v724_v35, %v724_v35 }
 0xa78   :  { %2398 = vmatmul.mubr.msk.bf16.vlgmr.msra.gmra.mrb[12].mxu0 %vm360_vm4, %v725_v39 }
 0xa79   :  { %2408 = vmatpush3.bf16.xpose.msra.mxu0 %v832_v54  ;;  %2409 = vmatprep.mubr.msk.bf16.mxu0 %vm2656_vm0, %v2655_v2  ;;  %v2592_v54 = vld [vmem:[%s3204_s11] sm:$0xff]  }
 0xa7a   :  { %2419 = vmatprep.subr.bf16.mxu0 %v2655_v2 }
 0xa80   :  { %2410 = vmatmul.mubr.msk.bf16.vlgmr.msra.gmra.mrb[16].mxu0 %vm360_vm4, %v825_v40  ;;  %v2593_v40 = vld [vmem:[%s3204_s11 + $0x8] sm:$0xff]  }
 0xa81   :  { %2421 = vmatprep.mubr.msk.bf16.mxu0 %vm2656_vm0, %v2655_v2  ;;  %2420 = vmatpush3.bf16.msra.mxu0 %v937_v61 }
 0xa82   :  { %2433 = vmatprep.subr.bf16.mxu0 %v2655_v2 }
 0xb4b   :  { %v768_v42 = vpop.f32.mrb[12].mxu0 }
 0xb4c   :  { %v774_v43 = vpack.c.bf16 %v768_v42, %v768_v42  ;;  %v2399_v45 = vpop.f32.mrb[13].mxu0 }
 0xb4d   :  { %v771_v47 = vpop.f32.mrb[14].mxu0 }
 0xb4e   :  { %v2400_v49 = vpop.f32.mrb[15].mxu0  ;;  %2404 = vmatmul.mubr.msk.bf16.vlgmr.msra.gmra.mrb[32].mxu1 %vm360_vm4, %v774_v43 }
 0xb4f   :  { %2414 = vmatpush3.bf16.msra.mxu1 %v888_v48  ;;  %2415 = vmatprep.mubr.msk.bf16.mxu1 %vm2656_vm0, %v2655_v2 }
 0xb50   :  { %2425 = vmatprep.subr.bf16.mxu1 %v2655_v2 }
 0xb53   :  { %v868_v50 = vpop.f32.mrb[16].mxu0 }
 0xb54   :  { %v869_v51 = vadd.f32 %v868_v50, %v2886_v7  ;;  %v2411_v52 = vpop.f32.mrb[17].mxu0 }
 0xb55   :  { %v871_v53 = vpop.f32.mrb[18].mxu0 }
 0xb56   :  { %v874_v55 = vmul.f32 1.442695, %v869_v51  ;;  %v2412_v56 = vpop.f32.mrb[19].mxu0 }
 0xb58   :  { %2618 = vpow2.f32 %v874_v55 }
 0xb62   :  { %v2619_v57 = vpop.eup %2618 }
 0xb63   :  { %v876_v58 = vsel %vm360_vm4, %v2619_v57, 0.0 }
 0xb64   :  { %877 = vadd.xlane.f32.xlu0 %v876_v58 }
 0xbf1   :  { %v878_v62 = vpop.xlane.xlu0 %877 }
 0xbf2   :  { %2620 = vrcp.f32 %v878_v62 }
 0xbfc   :  { %v2621_v63 = vpop.eup %2620 }
 0xbfd   :  { %v880_v0 = vmul.f32 %v2621_v63, %v2619_v57 }
 0xbff   :  { %v881_v1 = vpack.c.bf16 %v880_v0, %v880_v0 }
 0xc01   :  { %2416 = vmatmul.mubr.msk.bf16.vlgmr.msra.gmra.mrb[36].mxu1 %vm360_vm4, %v881_v1  ;;  %v2596_v1 = vld [vmem:[%s3197_s8 + $0x10] sm:$0xff]  }
 0xc02   :  { %2429 = vmatprep.mubr.msk.bf16.mxu1 %vm2656_vm0, %v2655_v2  ;;  %2426 = vmatpush3.bf16.msra.mxu1 %v2590_v27 }
 0xc03   :  { %2427 = vmatprep.subr.bf16.mxu1 %v2655_v2 }
 0xc06   :  { %2428 = vmatpush3.bf16.msra.mxu1 %v2591_v28 }
 0xc07   :  { %2445 = vmatprep.subr.bf16.mxu1 %v2655_v2 }
 0xc21   :  { %v817_v3 = vpop.f32.mrb[32].mxu1 }
 0xc22   :  { %v823_v4 = vadd.f32 %v817_v3, %v2940_v16  ;;  %v2405_v5 = vpop.f32.mrb[33].mxu1  ;;  %v2597_v3 = vld [vmem:[%s3197_s8 + $0x18] sm:$0xff]  }
 0xc23   :  { %v820_v11 = vpop.f32.mrb[34].mxu1 }
 0xc24   :  { %v2406_v12 = vpop.f32.mrb[35].mxu1 }
 0xc25   :  { %v1157_v12 = vrot.slane %v2761_v9, %v176_v30 }
 0xcd4   :  { %v924_v13 = vpop.f32.mrb[36].mxu1 }
 0xcd5   :  { %v930_v14 = vpack.c.bf16 %v924_v13, %v924_v13  ;;  %v2417_v15 = vpop.f32.mrb[37].mxu1 }
 0xcd6   :  { %v927_v17 = vpop.f32.mrb[38].mxu1 }
 0xcd7   :  { %v2418_v18 = vpop.f32.mrb[39].mxu1  ;;  %2422 = vmatmul.mubr.msk.bf16.vlgmr.msra.gmra.mrb[20].mxu0 %vm360_vm4, %v930_v14 }
 0xcd8   :  { %2441 = vmatprep.mubr.msk.bf16.mxu0 %vm2656_vm0, %v2655_v2  ;;  %2434 = vmatpush3.bf16.msra.mxu0 %v2592_v54 }
 0xcd9   :  { %2435 = vmatprep.subr.bf16.mxu0 %v2655_v2 }
 0xcdc   :  { %2436 = vmatpush3.bf16.msra.mxu0 %v2593_v40 }
 0xcdd   :  { %2437 = vmatprep.subr.bf16.mxu0 %v2655_v2 }
 0xce0   :  { %2438 = vmatpush3.bf16.msra.mxu0 %v2594_v8 }
 0xce1   :  { %2439 = vmatprep.subr.bf16.mxu0 %v2655_v2 }
 0xce4   :  { %2440 = vmatpush3.bf16.msra.mxu0 %v2595_v31 }
 0xce5   :  { %2461 = vmatprep.subr.bf16.mxu0 %v2655_v2 }
 0xdaa   :  { %v973_v20 = vpop.f32.mrb[20].mxu0 }
 0xdab   :  { %v979_v21 = vadd.f32 %v973_v20, %v823_v4  ;;  %v2423_v22 = vpop.f32.mrb[21].mxu0 }
 0xdac   :  { %v976_v23 = vpop.f32.mrb[22].mxu0 }
 0xdad   :  { %v980_v24 = vadd.f32 %v979_v21, %v2791_v19  ;;  %v2424_v16 = vpop.f32.mrb[23].mxu0 }
 0xdaf   :  { %v981_v25 = vmul.f32 %v980_v24, %v980_v24 }
 0xdb1   :  { %v982_v26 = vsel %vm165_vm3, %v981_v25, 0.0 }
 0xdb2   :  { %983 = vadd.xlane.f32.xlu1 %v982_v26 }
 0xe3f   :  { %v984_v19 = vpop.xlane.xlu1 %983 }
 0xe40   :  { %v985_v29 = vmul.f32 0.03125, %v984_v19 }
 0xe42   :  { %v986_v32 = vadd.f32 1e-06, %v985_v29 }
 0xe44   :  { %2622 = vrsqrt.f32 %v986_v32 }
 0xe4e   :  { %v2623_v34 = vpop.eup %2622 }
 0xe4f   :  { %v988_v35 = vmul.f32 %v2623_v34, %v980_v24 }
 0xe51   :  { %v993_v37 = vmul.f32 %v992_v33, %v988_v35 }
 0xe53   :  { %v994_v39 = vpack.c.bf16 %v993_v37, %v993_v37 }
 0xe55   :  { %2430 = vmatmul.mubr.msk.bf16.vlgmr.msra.gmra.mrb[40].mxu1 %vm165_vm3, %v994_v39 }
 0xe56   :  { %2449 = vmatprep.mubr.msk.bf16.mxu1 %vm2656_vm0, %v2655_v2  ;;  %2446 = vmatpush3.bf16.msra.mxu1 %v2596_v1 }
 0xe57   :  { %2447 = vmatprep.subr.bf16.mxu1 %v2655_v2 }
 0xe5a   :  { %2448 = vmatpush3.bf16.msra.mxu1 %v2597_v3 }
 0xe5b   :  { %2453 = vmatprep.subr.bf16.mxu1 %v2655_v2 }
 0xf28   :  { %v1048_v41 = vpop.f32.mrb[40].mxu1 }
 0xf29   :  { %1062 = vrot.lane.b32.xlu0 %v1048_v41, %s2658_s29  ;;  %v2431_v42 = vpop.f32.mrb[41].mxu1  ;;  %v1054_v47 = vsub.f32 0.0, %v1048_v41 }
 0xf2a   :  { %v1051_v43 = vpop.f32.mrb[42].mxu1 }
 0xf2b   :  { %v2432_v45 = vpop.f32.mrb[43].mxu1  ;;  %v1055_v48 = vmul.f32 1.442695, %v1054_v47 }
 0xf2d   :  { %2624 = vpow2.f32 %v1055_v48 }
 0xf37   :  { %v2625_v49 = vpop.eup %2624 }
 0xf38   :  { %v1057_v50 = vadd.f32 1.0, %v2625_v49 }
 0xf3a   :  { %2626 = vrcp.f32 %v1057_v50 }
 0xf44   :  { %v2627_v51 = vpop.eup %2626 }
 0xf45   :  { %v1060_v52 = vmul.f32 %v2627_v51, %v1048_v41 }
 0xf9b   :  { %v1063_v53 = vpop.permute.xlu0 %1062 }
 0xf9c   :  { %v1065_v55 = vmul.f32 %v1063_v53, %v1060_v52 }
 0xf9e   :  { %v1066_v56 = vpack.c.bf16 %v1065_v55, %v1065_v55 }
 0xfa0   :  { %2442 = vmatmul.mubr.msk.bf16.vlgmr.msra.gmra.mrb[24].mxu0 %vm1099_vm6, %v1066_v56 }
 0xfa1   :  { %2462 = vmatpush3.bf16.msra.mxu0 %v2817_v36  ;;  %2465 = vmatprep.mubr.msk.bf16.mxu0 %vm2656_vm0, %v2655_v2 }
 0xfa2   :  { %2463 = vmatprep.subr.bf16.mxu0 %v2655_v2 }
 0xfa5   :  { %2464 = vmatpush3.bf16.msra.mxu0 %v2827_v38 }
 0xfa6   :  { %2475 = vmatprep.subr.bf16.mxu0 %v2655_v2 }
0x1073   :  { %v1137_v57 = vpop.f32.mrb[24].mxu0 }
0x1074   :  { %v3020_v58 = vadd.f32 %v1137_v57, %v980_v24  ;;  %v2443_v59 = vpop.f32.mrb[25].mxu0 }
0x1075   :  { %v1140_v61 = vpop.f32.mrb[26].mxu0 }
0x1076   :  { %v2444_v62 = vpop.f32.mrb[27].mxu0  ;;  %v1146_v63 = vmul.f32 %v3020_v58, %v3020_v58 }
0x1078   :  { %v1147_v0 = vsel %vm165_vm3, %v1146_v63, 0.0 }
0x1079   :  { %1148 = vadd.xlane.f32.xlu0 %v1147_v0 }
0x1106   :  { %v1149_v4 = vpop.xlane.xlu0 %1148 }
0x1107   :  { %v1150_v5 = vmul.f32 0.03125, %v1149_v4 }
0x1109   :  { %v1151_v11 = vadd.f32 1e-06, %v1150_v5 }
0x110b   :  { %2628 = vrsqrt.f32 %v1151_v11  ;;  %v2183_v11 = vld [vmem:[%s3202_s9 + $0x10] sm:$0xf] }
0x1115   :  { %v2629_v13 = vpop.eup %2628 }
0x1116   :  { %v1153_v14 = vmul.f32 %v2629_v13, %v3020_v58 }
0x1118   :  { %v1158_v15 = vmul.f32 %v1157_v12, %v1153_v14  ;;  %v1590_v14 = vsel %vm420_vm5, %v2183_v11, 0 }
0x111a   :  { %v1159_v17 = vpack.c.bf16 %v1158_v15, %v1158_v15  ;;  %v2186_v15 = vld [vmem:[%s3202_s9 + $0x14] sm:$0xf] }
0x111c   :  { %2450 = vmatmul.mubr.msk.bf16.vlgmr.msra.gmra.mrb[44].mxu1 %vm165_vm3, %v1159_v17  ;;  %v1544_v17 = vsel %vm420_vm5, %v2186_v15, 0 }
0x111d   :  { %2454 = vmatpush3.bf16.msra.mxu1 %v2817_v36  ;;  %2457 = vmatprep.mubr.msk.bf16.mxu1 %vm2656_vm0, %v2655_v2 }
0x111e   :  { %2455 = vmatprep.subr.bf16.mxu1 %v2655_v2 }
0x1121   :  { %2456 = vmatpush3.bf16.msra.mxu1 %v2827_v38 }
0x1122   :  { %2469 = vmatprep.subr.bf16.mxu1 %v2655_v2 }
0x11ef   :  { %v1214_v6 = vpop.f32.mrb[44].mxu1 }
0x11f0   :  { %v3044_v9 = vpack.c.bf16 %v1214_v6, %v1214_v6  ;;  %v2451_v30 = vpop.f32.mrb[45].mxu1  ;;  %v1221_v21 = vmul.f32 %v1214_v6, %v2845_v44  ;;  %v1268_v33 = vmul.f32 %v1214_v6, %v2868_v60 }
0x11f1   :  { %v1217_v18 = vpop.f32.mrb[46].mxu1 }
0x11f2   :  { %1270 = vrot.lane.b32.xlu1 %v3044_v9, %s2659_s30  ;;  %v2452_v20 = vpop.f32.mrb[47].mxu1  ;;  %2458 = vmatmul.mubr.msk.bf16.vlgmr.msra.gmra.mrb[48].mxu1 %vm165_vm3, %v3044_v9 }
0x11f3   :  { %2471 = vmatprep.mubr.msk.bf16.mxu1 %vm2656_vm0, %v2655_v2 }
0x1264   :  { %v1271_v36 = vpop.permute.xlu1 %1270 }
0x1265   :  { %2466 = vmatmul.mubr.msk.bf16.vlgmr.msra.gmra.mrb[28].mxu0 %vm165_vm3, %v1271_v36 }
0x1266   :  { %2477 = vmatprep.mubr.msk.bf16.mxu0 %vm2656_vm0, %v2655_v2 }
0x12c5   :  { %v1259_v38 = vpop.f32.mrb[48].mxu1 }
0x12c6   :  { %v1265_v22 = vmul.f32 %v1259_v38, %v2858_v46  ;;  %v2459_v23 = vpop.f32.mrb[49].mxu1 }
0x12c7   :  { %v1262_v24 = vpop.f32.mrb[50].mxu1 }
0x12c8   :  { %v1266_v16 = vadd.f32 %v1265_v22, %v1221_v21  ;;  %v2460_v25 = vpop.f32.mrb[51].mxu1 }
0x12ca   :  { %v1267_v26 = vpack.c.bf16 %v1266_v16, %v1266_v16 }
0x12cc   :  { %1431 = vrot.lane.b32.xlu0 %v1267_v26, %s2661_s2 }
0x1338   :  { %v1309_v27 = vpop.f32.mrb[28].mxu0 }
0x1339   :  { %v1315_v28 = vmul.f32 %v1309_v27, %v2858_v46  ;;  %v2467_v19 = vpop.f32.mrb[29].mxu0 }
0x133a   :  { %v1312_v29 = vpop.f32.mrb[30].mxu0 }
0x133b   :  { %1317 = vrot.lane.b32.xlu1 %v1315_v28, %s2660_s14  ;;  %v2468_v32 = vpop.f32.mrb[31].mxu0 }
0x133e   :  { %v1432_v60 = vpop.permute.xlu0 %1431 }
0x13ad   :  { %v1318_v44 = vpop.permute.xlu1 %1317 }
0x13ae   :  { %v1320_v34 = vadd.f32 %v1318_v44, %v1268_v33 }
0x13b0   :  { %v1321_v35 = vpack.c.bf16 %v1320_v34, %v1320_v34 }
0x13b2   :  { %1323 = vrot.lane.b32.xlu1 %v1321_v35, %s2659_s30 }
0x13b6   :  { %1433 = vrot.lane.b32.xlu1 %v1321_v35, %s2662_s18 }
0x1424   :  { %v1324_v37 = vpop.permute.xlu1 %1323 }
0x1425   :  { %v1329_v39 = vsel %vm360_vm4, %v1324_v37, 0 }
0x1426   :  { %2470 = vmatpush3.bf16.xpose.msra.mxu1 %v1329_v39 }
0x1427   :  { %2481 = vmatprep.subr.bf16.mxu1 %v2655_v2 }
0x1428   :  { %v1434_v46 = vpop.permute.xlu1 %1433 }
0x1429   :  { %v1439_v54 = vsel %vm360_vm4, %v1434_v46, 0 }
0x142d   :  { %2472 = vmatmul.mubr.msk.bf16.vlgmr.msra.gmra.mrb[52].mxu1 %vm360_vm4, %v1267_v26 }
0x142e   :  { %2482 = vmatpush3.bf16.xpose.msra.mxu1 %v1439_v54  ;;  %2483 = vmatprep.mubr.msk.bf16.mxu1 %vm2656_vm0, %v2655_v2 }
0x142f   :  { %2493 = vmatprep.subr.bf16.mxu1 %v2655_v2 }
0x1435   :  { %2484 = vmatmul.mubr.msk.bf16.vlgmr.msra.gmra.mrb[56].mxu1 %vm360_vm4, %v1432_v60 }
0x1436   :  { %2495 = vmatprep.mubr.msk.bf16.mxu1 %vm2656_vm0, %v2655_v2  ;;  %2494 = vmatpush3.bf16.msra.mxu1 %v1544_v17 }
0x1437   :  { %2505 = vmatprep.subr.bf16.mxu1 %v2655_v2 }
0x1500   :  { %v1365_v40 = vpop.f32.mrb[52].mxu1 }
0x1501   :  { %v1366_v8 = vadd.f32 %v1365_v40, %v2886_v7  ;;  %v2473_v31 = vpop.f32.mrb[53].mxu1 }
0x1502   :  { %v1368_v41 = vpop.f32.mrb[54].mxu1 }
0x1503   :  { %v1371_v42 = vmul.f32 1.442695, %v1366_v8  ;;  %v2474_v43 = vpop.f32.mrb[55].mxu1 }
0x1504   :  { %v2191_v43 = vld [vmem:[%s3202_s9 + $0x18] sm:$0xf] }
0x1505   :  { %2630 = vpow2.f32 %v1371_v42 }
0x1508   :  { %v1475_v45 = vpop.f32.mrb[56].mxu1 }
0x1509   :  { %v1476_v47 = vadd.f32 %v1475_v45, %v2886_v7  ;;  %v2485_v48 = vpop.f32.mrb[57].mxu1  ;;  %v1745_v45 = vsel %vm420_vm5, %v2191_v43, 0 }
0x150a   :  { %v1478_v49 = vpop.f32.mrb[58].mxu1 }
0x150b   :  { %v1481_v50 = vmul.f32 1.442695, %v1476_v47  ;;  %v2486_v51 = vpop.f32.mrb[59].mxu1 }
0x150d   :  { %2632 = vpow2.f32 %v1481_v50 }
0x150f   :  { %v2631_v52 = vpop.eup %2630 }
0x1510   :  { %v1373_v53 = vsel %vm360_vm4, %v2631_v52, 0.0 }
0x1511   :  { %1374 = vadd.xlane.f32.xlu1 %v1373_v53 }
0x1517   :  { %v2633_v55 = vpop.eup %2632 }
0x1518   :  { %v1483_v56 = vsel %vm360_vm4, %v2633_v55, 0.0 }
0x1519   :  { %1484 = vadd.xlane.f32.xlu0 %v1483_v56 }
0x1522   :  { %1379 = vrot.lane.b32.xlu1 %v3044_v9, %s2658_s29 }
0x1526   :  { %1634 = vrot.lane.b32.xlu1 %v1321_v35, %s2664_s4 }
0x152a   :  { %1632 = vrot.lane.b32.xlu1 %v1267_v26, %s2665_s20 }
0x152f   :  { %1489 = vrot.lane.b32.xlu0 %v3044_v9, %s2663_s19 }
0x1533   :  { %1690 = vrot.lane.b32.xlu0 %v3044_v9, %s2666_s21 }
0x1537   :  { %1790 = vrot.lane.b32.xlu0 %v1321_v35, %s2667_s1 }
0x153b   :  { %1788 = vrot.lane.b32.xlu0 %v1267_v26, %s2668_s26 }
0x159e   :  { %v1375_v57 = vpop.xlane.xlu1 %1374 }
0x159f   :  { %2634 = vrcp.f32 %v1375_v57 }
0x15a2   :  { %v1380_v59 = vpop.permute.xlu1 %1379 }
0x15a3   :  { %v1385_v61 = vsel %vm420_vm5, %v1380_v59, 0 }
0x15a4   :  { %2476 = vmatpush3.bf16.msra.mxu0 %v1385_v61 }
0x15a5   :  { %2487 = vmatprep.subr.bf16.mxu0 %v2655_v2 }
0x15a6   :  { %v1485_v62 = vpop.xlane.xlu0 %1484  ;;  %v1635_v22 = vpop.permute.xlu1 %1634 }
0x15a7   :  { %2636 = vrcp.f32 %v1485_v62  ;;  %v1640_v26 = vsel %vm360_vm4, %v1635_v22, 0 }
0x15a9   :  { %v2635_v63 = vpop.eup %2634 }
0x15aa   :  { %v1377_v0 = vmul.f32 %v2635_v63, %v2631_v52  ;;  %v1490_v1 = vpop.permute.xlu0 %1489  ;;  %v1633_v28 = vpop.permute.xlu1 %1632 }
0x15ab   :  { %v1495_v4 = vsel %vm420_vm5, %v1490_v1, 0 }
0x15ac   :  { %v1378_v3 = vpack.c.bf16 %v1377_v0, %v1377_v0 }
0x15ae   :  { %2478 = vmatmul.mubr.msk.bf16.vlgmr.msra.gmra.mrb[32].mxu0 %vm360_vm4, %v1378_v3  ;;  %v1691_v6 = vpop.permute.xlu0 %1690 }
0x15af   :  { %2488 = vmatpush3.bf16.msra.mxu0 %v1495_v4  ;;  %2489 = vmatprep.mubr.msk.bf16.mxu0 %vm2656_vm0, %v2655_v2  ;;  %v1696_v38 = vsel %vm420_vm5, %v1691_v6, 0 }
0x15b0   :  { %2499 = vmatprep.subr.bf16.mxu0 %v2655_v2 }
0x15b1   :  { %v2637_v5 = vpop.eup %2636 }
0x15b2   :  { %v1487_v12 = vmul.f32 %v2637_v5, %v2633_v55  ;;  %v1791_v50 = vpop.permute.xlu0 %1790 }
0x15b3   :  { %v1796_v52 = vsel %vm360_vm4, %v1791_v50, 0 }
0x15b4   :  { %v1488_v13 = vpack.c.bf16 %v1487_v12, %v1487_v12 }
0x15b6   :  { %2490 = vmatmul.mubr.msk.bf16.vlgmr.msra.gmra.mrb[36].mxu0 %vm360_vm4, %v1488_v13  ;;  %v2195_v13 = vld [vmem:[%s3202_s9 + $0x1c] sm:$0xf] }
0x15b7   :  { %2500 = vmatpush3.bf16.msra.mxu0 %v1590_v14  ;;  %2501 = vmatprep.mubr.msk.bf16.mxu0 %vm2656_vm0, %v2655_v2  ;;  %v1901_v14 = vsel %vm420_vm5, %v2195_v13, 0 }
0x15b8   :  { %2511 = vmatprep.subr.bf16.mxu0 %v2655_v2 }
0x1681   :  { %v1421_v30 = vpop.f32.mrb[32].mxu0 }
0x1682   :  { %v1427_v18 = vpack.c.bf16 %v1421_v30, %v1421_v30  ;;  %v2479_v20 = vpop.f32.mrb[33].mxu0 }
0x1683   :  { %v1424_v36 = vpop.f32.mrb[34].mxu0 }
0x1684   :  { %v2480_v21 = vpop.f32.mrb[35].mxu0  ;;  %2502 = vmatmul.mubr.msk.bf16.vlgmr.msra.gmra.mrb[40].mxu0 %vm360_vm4, %v1427_v18 }
0x1685   :  { %2512 = vmatpush3.bf16.msra.mxu0 %v1696_v38  ;;  %2513 = vmatprep.mubr.msk.bf16.mxu0 %vm2656_vm0, %v2655_v2 }
0x1686   :  { %2523 = vmatprep.subr.bf16.mxu0 %v2655_v2 }
0x1689   :  { %v1531_v23 = vpop.f32.mrb[36].mxu0 }
0x168a   :  { %v1537_v24 = vpack.c.bf16 %v1531_v23, %v1531_v23  ;;  %v2491_v16 = vpop.f32.mrb[37].mxu0 }
0x168b   :  { %v1534_v25 = vpop.f32.mrb[38].mxu0 }
0x168c   :  { %v2492_v27 = vpop.f32.mrb[39].mxu0  ;;  %2496 = vmatmul.mubr.msk.bf16.vlgmr.msra.gmra.mrb[60].mxu1 %vm360_vm4, %v1537_v24 }
0x168d   :  { %2506 = vmatpush3.bf16.xpose.msra.mxu1 %v1640_v26  ;;  %2507 = vmatprep.mubr.msk.bf16.mxu1 %vm2656_vm0, %v2655_v2 }
0x168e   :  { %2517 = vmatprep.subr.bf16.mxu1 %v2655_v2 }
0x1694   :  { %2508 = vmatmul.mubr.msk.bf16.vlgmr.msra.gmra.mrb[64].mxu1 %vm360_vm4, %v1633_v28 }
0x1695   :  { %2519 = vmatprep.mubr.msk.bf16.mxu1 %vm2656_vm0, %v2655_v2  ;;  %2518 = vmatpush3.bf16.msra.mxu1 %v1745_v45 }
0x1696   :  { %2529 = vmatprep.subr.bf16.mxu1 %v2655_v2 }
0x1757   :  { %v1626_v19 = vpop.f32.mrb[40].mxu0 }
0x1758   :  { %v2503_v29 = vpop.f32.mrb[41].mxu0 }
0x1759   :  { %v1629_v32 = vpop.f32.mrb[42].mxu0 }
0x175a   :  { %v2504_v33 = vpop.f32.mrb[43].mxu0 }
0x175f   :  { %v1580_v44 = vpop.f32.mrb[60].mxu1 }
0x1760   :  { %v3120_v34 = vadd.f32 %v1626_v19, %v1580_v44  ;;  %v2497_v35 = vpop.f32.mrb[61].mxu1  ;;  %v2598_v44 = vld [vmem:[%s3203_s10 + $0x10] sm:$0xff]  }
0x1761   :  { %v1583_v37 = vpop.f32.mrb[62].mxu1 }
0x1762   :  { %v2498_v39 = vpop.f32.mrb[63].mxu1 }
0x1767   :  { %v1676_v46 = vpop.f32.mrb[64].mxu1 }
0x1768   :  { %v1677_v54 = vadd.f32 %v1676_v46, %v2886_v7  ;;  %v2509_v60 = vpop.f32.mrb[65].mxu1 }
0x1769   :  { %v1679_v40 = vpop.f32.mrb[66].mxu1 }
0x176a   :  { %v1682_v8 = vmul.f32 1.442695, %v1677_v54  ;;  %v2510_v31 = vpop.f32.mrb[67].mxu1  ;;  %v2600_v40 = vld [vmem:[%s3204_s11 + $0x20] sm:$0xff]  }
0x176b   :  { %v2602_v31 = vld [vmem:[%s3204_s11 + $0x30] sm:$0xff]  }
0x176c   :  { %2638 = vpow2.f32 %v1682_v8  ;;  %v2601_v8 = vld [vmem:[%s3204_s11 + $0x28] sm:$0xff]  }
0x1776   :  { %v2639_v41 = vpop.eup %2638 }
0x1777   :  { %v1684_v42 = vsel %vm360_vm4, %v2639_v41, 0.0 }
0x1778   :  { %1685 = vadd.xlane.f32.xlu1 %v1684_v42 }
0x1789   :  { %1846 = vrot.lane.b32.xlu1 %v3044_v9, %s2669_s0  ;;  %v1789_v9 = vpop.permute.xlu0 %1788 }
0x1805   :  { %v1686_v47 = vpop.xlane.xlu1 %1685 }
0x1806   :  { %2640 = vrcp.f32 %v1686_v47 }
0x1809   :  { %v1847_v53 = vpop.permute.xlu1 %1846 }
0x180a   :  { %v1852_v61 = vsel %vm420_vm5, %v1847_v53, 0 }
0x1810   :  { %v2641_v48 = vpop.eup %2640 }
0x1811   :  { %v1688_v49 = vmul.f32 %v2641_v48, %v2639_v41 }
0x1813   :  { %v1689_v51 = vpack.c.bf16 %v1688_v49, %v1688_v49 }
0x1815   :  { %2514 = vmatmul.mubr.msk.bf16.vlgmr.msra.gmra.mrb[44].mxu0 %vm360_vm4, %v1689_v51 }
0x1816   :  { %2524 = vmatpush3.bf16.xpose.msra.mxu0 %v1796_v52  ;;  %2525 = vmatprep.mubr.msk.bf16.mxu0 %vm2656_vm0, %v2655_v2 }
0x1817   :  { %2535 = vmatprep.subr.bf16.mxu0 %v2655_v2 }
0x181d   :  { %2526 = vmatmul.mubr.msk.bf16.vlgmr.msra.gmra.mrb[48].mxu0 %vm360_vm4, %v1789_v9 }
0x181e   :  { %2537 = vmatprep.mubr.msk.bf16.mxu0 %vm2656_vm0, %v2655_v2  ;;  %2536 = vmatpush3.bf16.msra.mxu0 %v1901_v14 }
0x181f   :  { %2549 = vmatprep.subr.bf16.mxu0 %v2655_v2 }
0x18e8   :  { %v1732_v55 = vpop.f32.mrb[44].mxu0 }
0x18e9   :  { %v1738_v56 = vpack.c.bf16 %v1732_v55, %v1732_v55  ;;  %v2515_v57 = vpop.f32.mrb[45].mxu0 }
0x18ea   :  { %v1735_v59 = vpop.f32.mrb[46].mxu0 }
0x18eb   :  { %v2516_v62 = vpop.f32.mrb[47].mxu0  ;;  %2520 = vmatmul.mubr.msk.bf16.vlgmr.msra.gmra.mrb[68].mxu1 %vm360_vm4, %v1738_v56 }
0x18ec   :  { %2530 = vmatpush3.bf16.msra.mxu1 %v1852_v61  ;;  %2531 = vmatprep.mubr.msk.bf16.mxu1 %vm2656_vm0, %v2655_v2 }
0x18ed   :  { %2541 = vmatprep.subr.bf16.mxu1 %v2655_v2 }
0x18f0   :  { %v1832_v63 = vpop.f32.mrb[48].mxu0 }
0x18f1   :  { %v1833_v0 = vadd.f32 %v1832_v63, %v2886_v7  ;;  %v2527_v1 = vpop.f32.mrb[49].mxu0 }
0x18f2   :  { %v1835_v3 = vpop.f32.mrb[50].mxu0 }
0x18f3   :  { %v1838_v4 = vmul.f32 1.442695, %v1833_v0  ;;  %v2528_v5 = vpop.f32.mrb[51].mxu0 }
0x18f4   :  { %v2217_v5 = vld [vmem:[%s3205_s6] ss:$0 sm:$0xff] }
0x18f5   :  { %2642 = vpow2.f32 %v1838_v4 }
0x18ff   :  { %v2643_v11 = vpop.eup %2642 }
0x1900   :  { %v1840_v12 = vsel %vm360_vm4, %v2643_v11, 0.0 }
0x1901   :  { %1841 = vadd.xlane.f32.xlu0 %v1840_v12 }
0x198e   :  { %v1842_v15 = vpop.xlane.xlu0 %1841 }
0x198f   :  { %2644 = vrcp.f32 %v1842_v15 }
0x1999   :  { %v2645_v7 = vpop.eup %2644 }
0x199a   :  { %v1844_v17 = vmul.f32 %v2645_v7, %v2643_v11 }
0x199c   :  { %v1845_v6 = vpack.c.bf16 %v1844_v17, %v1844_v17 }
0x199e   :  { %2532 = vmatmul.mubr.msk.bf16.vlgmr.msra.gmra.mrb[72].mxu1 %vm360_vm4, %v1845_v6 }
0x199f   :  { %2545 = vmatprep.mubr.msk.bf16.mxu1 %vm2656_vm0, %v2655_v2  ;;  %2542 = vmatpush3.bf16.msra.mxu1 %v2598_v44 }
0x19a0   :  { %2543 = vmatprep.subr.bf16.mxu1 %v2655_v2 }
0x19be   :  { %v1781_v30 = vpop.f32.mrb[68].mxu1 }
0x19bf   :  { %v1787_v18 = vadd.f32 %v1781_v30, %v3120_v34  ;;  %v2521_v20 = vpop.f32.mrb[69].mxu1  ;;  %v2599_v34 = vld [vmem:[%s3203_s10 + $0x18] sm:$0xff]  }
0x19c0   :  { %v1784_v36 = vpop.f32.mrb[70].mxu1  ;;  %2544 = vmatpush3.bf16.msra.mxu1 %v2599_v34 }
0x19c1   :  { %v2522_v38 = vpop.f32.mrb[71].mxu1 }
0x1a71   :  { %v1888_v21 = vpop.f32.mrb[72].mxu1 }
0x1a72   :  { %v1894_v22 = vpack.c.bf16 %v1888_v21, %v1888_v21  ;;  %v2533_v23 = vpop.f32.mrb[73].mxu1 }
0x1a73   :  { %v1891_v24 = vpop.f32.mrb[74].mxu1 }
0x1a74   :  { %v2534_v16 = vpop.f32.mrb[75].mxu1  ;;  %2538 = vmatmul.mubr.msk.bf16.vlgmr.msra.gmra.mrb[52].mxu0 %vm360_vm4, %v1894_v22 }
0x1a75   :  { %2557 = vmatprep.mubr.msk.bf16.mxu0 %vm2656_vm0, %v2655_v2  ;;  %2550 = vmatpush3.bf16.msra.mxu0 %v2600_v40 }
0x1a76   :  { %2551 = vmatprep.subr.bf16.mxu0 %v2655_v2 }
0x1a79   :  { %2552 = vmatpush3.bf16.msra.mxu0 %v2601_v8 }
0x1a7a   :  { %2553 = vmatprep.subr.bf16.mxu0 %v2655_v2 }
0x1a7d   :  { %2554 = vmatpush3.bf16.msra.mxu0 %v2602_v31 }
0x1a7e   :  { %2555 = vmatprep.subr.bf16.mxu0 %v2655_v2 }
0x1b47   :  { %v1937_v25 = vpop.f32.mrb[52].mxu0 }
0x1b48   :  { %v1943_v26 = vadd.f32 %v1937_v25, %v1787_v18  ;;  %v2539_v27 = vpop.f32.mrb[53].mxu0 }
0x1b49   :  { %v1940_v28 = vpop.f32.mrb[54].mxu0 }
0x1b4a   :  { %v1944_v19 = vadd.f32 %v1943_v26, %v3020_v58  ;;  %v2540_v29 = vpop.f32.mrb[55].mxu0 }
0x1b4c   :  { %v1945_v32 = vmul.f32 %v1944_v19, %v1944_v19 }
0x1b4e   :  { %v1946_v33 = vsel %vm165_vm3, %v1945_v32, 0.0 }
0x1b4f   :  { %1947 = vadd.xlane.f32.xlu1 %v1946_v33 }
0x1bdc   :  { %v1948_v35 = vpop.xlane.xlu1 %1947 }
0x1bdd   :  { %v1949_v37 = vmul.f32 0.03125, %v1948_v35 }
0x1bdf   :  { %v1950_v58 = vadd.f32 1e-06, %v1949_v37 }
0x1be1   :  { %2646 = vrsqrt.f32 %v1950_v58 }
0x1beb   :  { %v2647_v39 = vpop.eup %2646 }
0x1bec   :  { %v1952_v46 = vmul.f32 %v2647_v39, %v1944_v19 }
0x1bee   :  { %v1957_v54 = vmul.f32 %v2766_v10, %v1952_v46  ;;  %v2603_v10 = vld [vmem:[%s3204_s11 + $0x38] sm:$0xff]  }
0x1bef   :  { %2556 = vmatpush3.bf16.msra.mxu0 %v2603_v10 }
0x1bf0   :  { %v1958_v60 = vpack.c.bf16 %v1957_v54, %v1957_v54 }
0x1bf2   :  { %2546 = vmatmul.mubr.msk.bf16.vlgmr.msra.gmra.mrb[76].mxu1 %vm165_vm3, %v1958_v60 }
0x1cc5   :  { %v2013_v41 = vpop.f32.mrb[76].mxu1 }
0x1cc6   :  { %2027 = vrot.lane.b32.xlu0 %v2013_v41, %s2658_s29  ;;  %v2547_v42 = vpop.f32.mrb[77].mxu1  ;;  %v2019_v47 = vsub.f32 0.0, %v2013_v41 }
0x1cc7   :  { %v2016_v43 = vpop.f32.mrb[78].mxu1 }
0x1cc8   :  { %v2548_v45 = vpop.f32.mrb[79].mxu1  ;;  %v2020_v48 = vmul.f32 1.442695, %v2019_v47 }
0x1cca   :  { %2648 = vpow2.f32 %v2020_v48 }
0x1cd4   :  { %v2649_v49 = vpop.eup %2648 }
0x1cd5   :  { %v2022_v50 = vadd.f32 1.0, %v2649_v49 }
0x1cd7   :  { %2650 = vrcp.f32 %v2022_v50 }
0x1ce1   :  { %v2651_v51 = vpop.eup %2650 }
0x1ce2   :  { %v2025_v52 = vmul.f32 %v2651_v51, %v2013_v41 }
0x1d38   :  { %v2028_v2 = vpop.permute.xlu0 %2027 }
0x1d39   :  { %v2030_v9 = vmul.f32 %v2028_v2, %v2025_v52 }
0x1d3b   :  { %v2031_v53 = vpack.c.bf16 %v2030_v9, %v2030_v9 }
0x1d3d   :  { %2558 = vmatmul.mubr.msk.bf16.vlgmr.msra.gmra.mrb[56].mxu0 %vm1099_vm6, %v2031_v53 }
0x1e10   :  { %v2102_v55 = vpop.f32.mrb[56].mxu0 }
0x1e11   :  { %v2108_v56 = vadd.f32 %v2102_v55, %v1944_v19  ;;  %v2559_v57 = vpop.f32.mrb[57].mxu0 }
0x1e12   :  { %v2105_v59 = vpop.f32.mrb[58].mxu0 }
0x1e13   :  { %v2560_v61 = vpop.f32.mrb[59].mxu0  ;;  %v2110_v62 = vmul.f32 %v2108_v56, %v2108_v56 }
0x1e15   :  { %v2111_v63 = vsel %vm165_vm3, %v2110_v62, 0.0 }
0x1e16   :  { %2112 = vadd.xlane.f32.xlu0 %v2111_v63 }
0x1ea3   :  { %v2113_v0 = vpop.xlane.xlu0 %2112 }
0x1ea4   :  { %v2114_v1 = vmul.f32 0.03125, %v2113_v0 }
0x1ea6   :  { %v2115_v3 = vadd.f32 1e-06, %v2114_v1 }
0x1ea8   :  { %2652 = vrsqrt.f32 %v2115_v3 }
0x1eb2   :  { %v2653_v4 = vpop.eup %2652 }
0x1eb3   :  { %v2117_v11 = vmul.f32 %v2653_v4, %v2108_v56 }
0x1eb5   :  { %v2124_v12 = vmul.f32 %v2217_v5, %v2117_v11 }
0x1eb7   :  { %2125 = vst.msk [vmem:[%s3206_s12] sm:$0xff] %vm165_vm3, %v2124_v12 }

</bundles_post_ra>
